<compile_context>
chip_gen: v7x
topology: tpu7x:2x2x1
jax: 0.10.0
libtpu: 0.0.40
codegen_flags: <defaults>
</compile_context>

<pallas_src>
import functools
import math

import numpy as np

import jax
import jax.numpy as jnp
from jax import lax
from jax.experimental import pallas as pl
from jax.experimental.pallas import tpu as pltpu


# ----------------------------------------------------------------------------
# Fused kernel: one batch *tile* (BN elements) per grid step.
# ----------------------------------------------------------------------------
def fused_cnn_kernel(x_ref, B1_ref, b1_ref, B2_ref, b2_ref, wh_ref, bh_ref,
                     o_ref, xp_ref, h1p_ref, pooled_ref):
    # x_ref  : (BN, H, W*Cin)   row-flattened NHWC input tile (bf16)
    # B1_ref : (3, W*Cin, W*C1) banded row-conv weights for conv1, bf16 (one per kh tap)
    # b1_ref : (1, W*C1)        conv1 bias tiled over W (f32)
    # B2_ref : (3, W*C1, W*F)   banded row-conv weights for conv2, bf16
    # b2_ref : (1, W*F)         conv2 bias tiled over W (f32)
    # wh_ref : (W*F, C_pad)     head weights tiled over W, pre-scaled by 1/(H*W), f32
    # bh_ref : (1, C_pad)       head bias, lane-padded (f32)
    # o_ref  : (1, BN, C_pad)   padded logits for this batch tile (lane-dense store)
    # xp_ref : VMEM (BN*(H+2), W*Cin) bf16  zero-separated input slab  (SAME padding in H)
    # h1p_ref: VMEM (BN*(H+2), W*C1)  bf16  zero-separated conv1 slab
    # pooled_ref: VMEM (BN, W*F) f32        per-element spatial sums
    BN, H, WCin = x_ref.shape
    Hp = H + 2
    T = xp_ref.shape[0]          # BN * (H + 2)
    WC1 = h1p_ref.shape[1]
    M = T - 2                    # conv-output rows (real rows + discarded separator rows)

    zin = jnp.zeros((1, WCin), xp_ref.dtype)
    zh1 = jnp.zeros((1, WC1), h1p_ref.dtype)

    # ---- assemble zero-separated input slab (borders rewritten every step: megacore-safe) ----
    for b in range(BN):
        base = b * Hp
        xp_ref[base:base + 1, :] = zin                       # top zero border of element b
        xp_ref[base + 1:base + 1 + H, :] = x_ref[b]          # real rows
        xp_ref[base + H + 1:base + H + 2, :] = zin           # bottom zero border

    # ---- conv1: 3x3 SAME as three banded row matmuls over the whole slab (K = W*Cin) --------
    h1 = jnp.dot(xp_ref[0:M, :], B1_ref[0], preferred_element_type=jnp.float32)
    h1 = h1 + jnp.dot(xp_ref[1:M + 1, :], B1_ref[1], preferred_element_type=jnp.float32)
    h1 = h1 + jnp.dot(xp_ref[2:M + 2, :], B1_ref[2], preferred_element_type=jnp.float32)
    h1 = jnp.maximum(h1 + b1_ref[...], 0.0)                  # (M, W*C1) f32

    # ---- write conv1 slab (shifted by one row) and re-zero all border/separator rows --------
    h1p_ref[1:M + 1, :] = h1.astype(h1p_ref.dtype)
    for b in range(BN):
        base = b * Hp
        h1p_ref[base:base + 1, :] = zh1
        h1p_ref[base + H + 1:base + H + 2, :] = zh1

    # ---- conv2: same trick (K = W*C1) --------------------------------------------------------
    h2 = jnp.dot(h1p_ref[0:M, :], B2_ref[0], preferred_element_type=jnp.float32)
    h2 = h2 + jnp.dot(h1p_ref[1:M + 1, :], B2_ref[1], preferred_element_type=jnp.float32)
    h2 = h2 + jnp.dot(h1p_ref[2:M + 2, :], B2_ref[2], preferred_element_type=jnp.float32)
    h2 = jnp.maximum(h2 + b2_ref[...], 0.0)                  # (M, W*F) f32

    # ---- global average pool (1/(H*W) folded into wh) + linear head -------------------------
    for b in range(BN):
        base = b * Hp                                        # element b's real rows in h2
        pooled_ref[b:b + 1, :] = jnp.sum(h2[base:base + H, :], axis=0, keepdims=True)
    logits = jnp.dot(pooled_ref[...], wh_ref[...],
                     preferred_element_type=jnp.float32) + bh_ref[...]
    o_ref[0] = logits.astype(o_ref.dtype)                    # (BN, C_pad), lane-dense


# ----------------------------------------------------------------------------
# One-time weight preparation (offline, outside the jitted hot path).
# ----------------------------------------------------------------------------
def _row_banded(w_hwio, W):
    """(3,3,Cin,Cout) HWIO conv weights -> (3, W*Cin, W*Cout) banded row-matmul weights.

    B[kh, wi*Cin + ci, wo*Cout + co] = w[kh, wi - wo + 1, ci, co] for wi - wo + 1 in {0,1,2};
    SAME boundary handling in W is implicit (out-of-range taps are absent from the band).
    """
    _, _, cin, cout = w_hwio.shape
    w_np = np.asarray(w_hwio, dtype=np.float32)
    out = np.zeros((3, W * cin, W * cout), np.float32)
    for kh in range(3):
        for wo in range(W):
            for kw in range(3):
                wi = wo + kw - 1
                if 0 <= wi < W:
                    out[kh, wi * cin:(wi + 1) * cin,
                        wo * cout:(wo + 1) * cout] = w_np[kh, kw]
    return out


def prepare_params(params, H, W, lane_pad=128):
    cin = params["w1"].shape[2]
    c1 = params["b1"].shape[0]
    f = params["b2"].shape[0]
    c = params["b_head"].shape[0]
    c_pad = ((c + lane_pad - 1) // lane_pad) * lane_pad

    # Zero-pad Cin so W*Cin is a multiple of 128 (lane-dense, aligned K for conv1).
    step = 128 // math.gcd(W, 128)
    cin_pad = ((cin + step - 1) // step) * step
    w1 = np.asarray(params["w1"], np.float32)
    w1 = np.pad(w1, ((0, 0), (0, 0), (0, cin_pad - cin), (0, 0)))

    wh = np.asarray(params["w_head"], np.float32) / float(H * W)   # fold the mean scale (exact)
    wh_big = np.tile(wh, (W, 1))                                   # (W*F, C)
    wh_big = np.pad(wh_big, ((0, 0), (0, c_pad - c)))              # lane-dense head
    bh = np.pad(np.asarray(params["b_head"], np.float32), (0, c_pad - c))

    return {
        # bf16 banded conv weights (f32 accumulation in-kernel); biases / head stay f32.
        "B1": jnp.asarray(_row_banded(w1, W), dtype=jnp.bfloat16),
        "b1": jnp.asarray(np.tile(np.asarray(params["b1"], np.float32), W)).reshape(1, W * c1),
        "B2": jnp.asarray(_row_banded(np.asarray(params["w2"], np.float32), W),
                          dtype=jnp.bfloat16),
        "b2": jnp.asarray(np.tile(np.asarray(params["b2"], np.float32), W)).reshape(1, W * f),
        "Wh": jnp.asarray(wh_big),
        "bh": jnp.asarray(bh).reshape(1, c_pad),
    }


def _pick_batch_tile(n, h):
    """Largest divisor of n whose slab height ~<= 256 rows (MXU M target on v6e/v7x)."""
    max_bn = max(1, 256 // (h + 2))
    bn = 1
    for d in range(1, n + 1):
        if n % d == 0 and d <= max_bn:
            bn = d
    return bn


# ----------------------------------------------------------------------------
# Forward pass: one fused pallas_call.
# ----------------------------------------------------------------------------
@functools.partial(jax.jit, static_argnames=("num_classes",))
def classification_model_forward(x_nchw, prep, num_classes):
    N, Cin, H, W = x_nchw.shape
    WCin = prep["B1"].shape[1]
    cin_pad = WCin // W
    WC1 = prep["b1"].shape[1]
    WF = prep["b2"].shape[1]
    C_pad = prep["bh"].shape[1]

    # NCHW -> NHWC, zero-pad channels to cin_pad, flatten rows to (N, H, W*cin_pad), cast bf16.
    # TODO(synk): accept NHWC upstream / fold this relayout into the kernel DMA for large images.
    x = jnp.transpose(x_nchw, (0, 2, 3, 1))
    if cin_pad != Cin:
        x = jnp.pad(x, ((0, 0), (0, 0), (0, 0), (0, cin_pad - Cin)))
    x_rows = x.reshape(N, H, WCin).astype(jnp.bfloat16)

    BN = _pick_batch_tile(N, H)       # whole batch in one step for the demo (N=2 -> grid=(1,))
    steps = N // BN
    T = BN * (H + 2)

    out = pl.pallas_call(
        fused_cnn_kernel,
        out_shape=jax.ShapeDtypeStruct((steps, BN, C_pad), jnp.float32),
        grid_spec=pltpu.PrefetchScalarGridSpec(
            num_scalar_prefetch=0,
            grid=(steps,),
            in_specs=[
                pl.BlockSpec((BN, H, WCin), lambda n: (n, 0, 0)),
                pl.BlockSpec((3, WCin, WC1), lambda n: (0, 0, 0)),
                pl.BlockSpec((1, WC1), lambda n: (0, 0)),
                pl.BlockSpec((3, WC1, WF), lambda n: (0, 0, 0)),
                pl.BlockSpec((1, WF), lambda n: (0, 0)),
                pl.BlockSpec((WF, C_pad), lambda n: (0, 0)),
                pl.BlockSpec((1, C_pad), lambda n: (0, 0)),
            ],
            out_specs=pl.BlockSpec((1, BN, C_pad), lambda n: (n, 0, 0)),
            scratch_shapes=[
                pltpu.VMEM((T, WCin), jnp.bfloat16),    # zero-separated input slab
                pltpu.VMEM((T, WC1), jnp.bfloat16),     # zero-separated conv1 slab
                pltpu.VMEM((BN, WF), jnp.float32),      # per-element pooled sums
            ],
        ),
        compiler_params=pltpu.CompilerParams(
            dimension_semantics=("parallel",),          # batch tiles across TCs on v7x
        ),
    )(x_rows, prep["B1"], prep["b1"], prep["B2"], prep["b2"],
      prep["Wh"], prep["bh"])

    return out.reshape(N, C_pad)[:, :num_classes]       # drop lane padding


# ----------------------------------------------------------------------------
# Raw (PyTorch-convention) parameters + pure-JAX reference.
# ----------------------------------------------------------------------------
def init_params(key, c_in, hidden, out_features, num_classes):
    k1, k2, k3 = jax.random.split(key, 3)
    scale1 = 1.0 / jnp.sqrt(9.0 * c_in)
    scale2 = 1.0 / jnp.sqrt(9.0 * hidden)
    scale3 = 1.0 / jnp.sqrt(float(out_features))
    return {
        # HWIO conv weights
        "w1": jax.random.normal(k1, (3, 3, c_in, hidden), jnp.float32) * scale1,
        "b1": jnp.zeros((hidden,), jnp.float32),
        "w2": jax.random.normal(k2, (3, 3, hidden, out_features), jnp.float32) * scale2,
        "b2": jnp.zeros((out_features,), jnp.float32),
        # head: Linear(out_features, num_classes)
        "w_head": jax.random.normal(k3, (out_features, num_classes), jnp.float32) * scale3,
        "b_head": jnp.zeros((num_classes,), jnp.float32),
    }


def _reference_forward(x_nchw, params):
    x = jnp.transpose(x_nchw, (0, 2, 3, 1))
    dn = lax.conv_dimension_numbers(x.shape, params["w1"].shape,
                                    ("NHWC", "HWIO", "NHWC"))
    h1 = lax.conv_general_dilated(x, params["w1"], (1, 1), "SAME",
                                  dimension_numbers=dn) + params["b1"]
    h1 = jnp.maximum(h1, 0.0)
    dn2 = lax.conv_dimension_numbers(h1.shape, params["w2"].shape,
                                     ("NHWC", "HWIO", "NHWC"))
    h2 = lax.conv_general_dilated(h1, params["w2"], (1, 1), "SAME",
                                  dimension_numbers=dn2) + params["b2"]
    h2 = jnp.maximum(h2, 0.0)
    pooled = jnp.mean(h2, axis=(1, 2))
    return pooled @ params["w_head"] + params["b_head"]


if __name__ == "__main__":
    key = jax.random.PRNGKey(0)
    kx, kp = jax.random.split(key)

    N, C_IN, H, W = 2, 4, 16, 16
    HIDDEN, OUT_FEATURES, NUM_CLASSES = 16, 32, 10

    x = jax.random.normal(kx, (N, C_IN, H, W), jnp.float32)   # NCHW like PyTorch
    params = init_params(kp, C_IN, HIDDEN, OUT_FEATURES, NUM_CLASSES)
    prep = prepare_params(params, H, W)                       # offline weight repack (bf16 bands)

    logits = classification_model_forward(x, prep, num_classes=NUM_CLASSES)
    logits = jax.block_until_ready(logits)

    ref = _reference_forward(x, params)
    assert logits.shape == (N, NUM_CLASSES)
    max_err = float(jnp.max(jnp.abs(logits - ref)))
    # bf16 conv operands with f32 accumulation -> loosened tolerance vs the f32 reference.
    assert jnp.allclose(logits, ref, atol=5e-2, rtol=5e-2), \
        f"mismatch vs reference, max|err|={max_err}"

    print("KERNEL_OK")
</pallas_src>

<mosaic_0001>
module attributes {stable_mosaic.version = 11 : i64} {
  func.func @fused_cnn_kernel(%arg0: i32, %arg1: memref<2x16x128xbf16, #tpu.memory_space<vmem>>, %arg2: memref<3x128x256xbf16, #tpu.memory_space<vmem>>, %arg3: memref<1x256xf32, #tpu.memory_space<vmem>>, %arg4: memref<3x256x512xbf16, #tpu.memory_space<vmem>>, %arg5: memref<1x512xf32, #tpu.memory_space<vmem>>, %arg6: memref<512x128xf32, #tpu.memory_space<vmem>>, %arg7: memref<1x128xf32, #tpu.memory_space<vmem>>, %arg8: memref<1x2x128xf32, #tpu.memory_space<vmem>>, %arg9: memref<36x128xbf16, #tpu.memory_space<vmem>>, %arg10: memref<36x256xbf16, #tpu.memory_space<vmem>>, %arg11: memref<2x512xf32, #tpu.memory_space<vmem>>) attributes {dimension_semantics = [#tpu.dimension_semantics<parallel>], iteration_bounds = array<i64: 1>, scalar_prefetch = 0 : i64, scratch_operands = 3 : i64, tpu.core_type = #tpu.core_type<tc>, window_params = [{transform_indices = @transform_0, window_bounds = array<i64: 2, 16, 128>}, {pipeline_mode = #tpu.pipeline_mode<synchronous>, transform_indices = @transform_1, window_bounds = array<i64: 3, 128, 256>}, {pipeline_mode = #tpu.pipeline_mode<synchronous>, transform_indices = @transform_2, window_bounds = array<i64: 1, 256>}, {pipeline_mode = #tpu.pipeline_mode<synchronous>, transform_indices = @transform_3, window_bounds = array<i64: 3, 256, 512>}, {pipeline_mode = #tpu.pipeline_mode<synchronous>, transform_indices = @transform_4, window_bounds = array<i64: 1, 512>}, {pipeline_mode = #tpu.pipeline_mode<synchronous>, transform_indices = @transform_5, window_bounds = array<i64: 512, 128>}, {pipeline_mode = #tpu.pipeline_mode<synchronous>, transform_indices = @transform_6, window_bounds = array<i64: 1, 128>}, {transform_indices = @transform_7, window_bounds = array<i64: 1, 2, 128>}]} {
    %cst = arith.constant 0.000000e+00 : bf16
    %0 = vector.broadcast %cst : bf16 to vector<1x128xbf16>
    %cst_0 = arith.constant 0.000000e+00 : bf16
    %1 = vector.broadcast %cst_0 : bf16 to vector<1x256xbf16>
    %c0 = arith.constant 0 : index
    %c0_1 = arith.constant 0 : index
    %2 = vector.load %arg9[%c0, %c0_1] : memref<36x128xbf16, #tpu.memory_space<vmem>>, vector<1x128xbf16>
    tpu.vector_store %arg9[%c0, %c0_1], %0 {strides = array<i32>} : memref<36x128xbf16, #tpu.memory_space<vmem>>, vector<1x128xbf16>,
    %c0_2 = arith.constant 0 : index
    %c0_3 = arith.constant 0 : index
    %c0_4 = arith.constant 0 : index
    %3 = vector.load %arg1[%c0_2, %c0_3, %c0_4] : memref<2x16x128xbf16, #tpu.memory_space<vmem>>, vector<1x16x128xbf16>
    %4 = vector.shape_cast %3 : vector<1x16x128xbf16> to vector<16x128xbf16>
    %c1 = arith.constant 1 : index
    %c0_5 = arith.constant 0 : index
    %5 = vector.load %arg9[%c1, %c0_5] : memref<36x128xbf16, #tpu.memory_space<vmem>>, vector<16x128xbf16>
    tpu.vector_store %arg9[%c1, %c0_5], %4 {strides = array<i32>} : memref<36x128xbf16, #tpu.memory_space<vmem>>, vector<16x128xbf16>,
    %c17 = arith.constant 17 : index
    %c0_6 = arith.constant 0 : index
    %6 = vector.load %arg9[%c17, %c0_6] : memref<36x128xbf16, #tpu.memory_space<vmem>>, vector<1x128xbf16>
    tpu.vector_store %arg9[%c17, %c0_6], %0 {strides = array<i32>} : memref<36x128xbf16, #tpu.memory_space<vmem>>, vector<1x128xbf16>,
    %c18 = arith.constant 18 : index
    %c0_7 = arith.constant 0 : index
    %7 = vector.load %arg9[%c18, %c0_7] : memref<36x128xbf16, #tpu.memory_space<vmem>>, vector<1x128xbf16>
    tpu.vector_store %arg9[%c18, %c0_7], %0 {strides = array<i32>} : memref<36x128xbf16, #tpu.memory_space<vmem>>, vector<1x128xbf16>,
    %c1_8 = arith.constant 1 : index
    %c0_9 = arith.constant 0 : index
    %c0_10 = arith.constant 0 : index
    %8 = vector.load %arg1[%c1_8, %c0_9, %c0_10] : memref<2x16x128xbf16, #tpu.memory_space<vmem>>, vector<1x16x128xbf16>
    %9 = vector.shape_cast %8 : vector<1x16x128xbf16> to vector<16x128xbf16>
    %c19 = arith.constant 19 : index
    %c0_11 = arith.constant 0 : index
    %10 = vector.load %arg9[%c19, %c0_11] : memref<36x128xbf16, #tpu.memory_space<vmem>>, vector<16x128xbf16>
    tpu.vector_store %arg9[%c19, %c0_11], %9 {strides = array<i32>} : memref<36x128xbf16, #tpu.memory_space<vmem>>, vector<16x128xbf16>,
    %c35 = arith.constant 35 : index
    %c0_12 = arith.constant 0 : index
    %11 = vector.load %arg9[%c35, %c0_12] : memref<36x128xbf16, #tpu.memory_space<vmem>>, vector<1x128xbf16>
    tpu.vector_store %arg9[%c35, %c0_12], %0 {strides = array<i32>} : memref<36x128xbf16, #tpu.memory_space<vmem>>, vector<1x128xbf16>,
    %c0_13 = arith.constant 0 : index
    %c0_14 = arith.constant 0 : index
    %12 = vector.load %arg9[%c0_13, %c0_14] : memref<36x128xbf16, #tpu.memory_space<vmem>>, vector<34x128xbf16>
    %c0_15 = arith.constant 0 : index
    %c0_16 = arith.constant 0 : index
    %c0_17 = arith.constant 0 : index
    %13 = vector.load %arg2[%c0_15, %c0_16, %c0_17] : memref<3x128x256xbf16, #tpu.memory_space<vmem>>, vector<1x128x256xbf16>
    %14 = vector.shape_cast %13 : vector<1x128x256xbf16> to vector<128x256xbf16>
    %cst_18 = arith.constant dense<0.000000e+00> : vector<34x256xf32>
    %15 = tpu.matmul %12, %14, %cst_18 {dimension_numbers = #tpu.dot_dimension_numbers<[1], [0], [0], [1], [0, 0, 1, 1], [], []>} : vector<34x128xbf16>, vector<128x256xbf16>, vector<34x256xf32> -> vector<34x256xf32>
    %c1_19 = arith.constant 1 : index
    %c0_20 = arith.constant 0 : index
    %16 = vector.load %arg9[%c1_19, %c0_20] : memref<36x128xbf16, #tpu.memory_space<vmem>>, vector<34x128xbf16>
    %c1_21 = arith.constant 1 : index
    %c0_22 = arith.constant 0 : index
    %c0_23 = arith.constant 0 : index
    %17 = vector.load %arg2[%c1_21, %c0_22, %c0_23] : memref<3x128x256xbf16, #tpu.memory_space<vmem>>, vector<1x128x256xbf16>
    %18 = vector.shape_cast %17 : vector<1x128x256xbf16> to vector<128x256xbf16>
    %cst_24 = arith.constant dense<0.000000e+00> : vector<34x256xf32>
    %19 = tpu.matmul %16, %18, %cst_24 {dimension_numbers = #tpu.dot_dimension_numbers<[1], [0], [0], [1], [0, 0, 1, 1], [], []>} : vector<34x128xbf16>, vector<128x256xbf16>, vector<34x256xf32> -> vector<34x256xf32>
    %20 = arith.addf %15, %19 : vector<34x256xf32>
    %c2 = arith.constant 2 : index
    %c0_25 = arith.constant 0 : index
    %21 = vector.load %arg9[%c2, %c0_25] : memref<36x128xbf16, #tpu.memory_space<vmem>>, vector<34x128xbf16>
    %c2_26 = arith.constant 2 : index
    %c0_27 = arith.constant 0 : index
    %c0_28 = arith.constant 0 : index
    %22 = vector.load %arg2[%c2_26, %c0_27, %c0_28] : memref<3x128x256xbf16, #tpu.memory_space<vmem>>, vector<1x128x256xbf16>
    %23 = vector.shape_cast %22 : vector<1x128x256xbf16> to vector<128x256xbf16>
    %cst_29 = arith.constant dense<0.000000e+00> : vector<34x256xf32>
    %24 = tpu.matmul %21, %23, %cst_29 {dimension_numbers = #tpu.dot_dimension_numbers<[1], [0], [0], [1], [0, 0, 1, 1], [], []>} : vector<34x128xbf16>, vector<128x256xbf16>, vector<34x256xf32> -> vector<34x256xf32>
    %25 = arith.addf %20, %24 : vector<34x256xf32>
    %c0_30 = arith.constant 0 : index
    %c0_31 = arith.constant 0 : index
    %26 = vector.load %arg3[%c0_30, %c0_31] : memref<1x256xf32, #tpu.memory_space<vmem>>, vector<1x256xf32>
    %27 = vector.broadcast %26 : vector<1x256xf32> to vector<34x256xf32>
    %28 = arith.addf %25, %27 : vector<34x256xf32>
    %cst_32 = arith.constant 0.000000e+00 : f32
    %29 = vector.broadcast %cst_32 : f32 to vector<34x256xf32>
    %30 = arith.maximumf %28, %29 : vector<34x256xf32>
    %31 = arith.truncf %30 : vector<34x256xf32> to vector<34x256xbf16>
    %c1_33 = arith.constant 1 : index
    %c0_34 = arith.constant 0 : index
    %32 = vector.load %arg10[%c1_33, %c0_34] : memref<36x256xbf16, #tpu.memory_space<vmem>>, vector<34x256xbf16>
    tpu.vector_store %arg10[%c1_33, %c0_34], %31 {strides = array<i32>} : memref<36x256xbf16, #tpu.memory_space<vmem>>, vector<34x256xbf16>,
    %c0_35 = arith.constant 0 : index
    %c0_36 = arith.constant 0 : index
    %33 = vector.load %arg10[%c0_35, %c0_36] : memref<36x256xbf16, #tpu.memory_space<vmem>>, vector<1x256xbf16>
    tpu.vector_store %arg10[%c0_35, %c0_36], %1 {strides = array<i32>} : memref<36x256xbf16, #tpu.memory_space<vmem>>, vector<1x256xbf16>,
    %c17_37 = arith.constant 17 : index
    %c0_38 = arith.constant 0 : index
    %34 = vector.load %arg10[%c17_37, %c0_38] : memref<36x256xbf16, #tpu.memory_space<vmem>>, vector<1x256xbf16>
    tpu.vector_store %arg10[%c17_37, %c0_38], %1 {strides = array<i32>} : memref<36x256xbf16, #tpu.memory_space<vmem>>, vector<1x256xbf16>,
    %c18_39 = arith.constant 18 : index
    %c0_40 = arith.constant 0 : index
    %35 = vector.load %arg10[%c18_39, %c0_40] : memref<36x256xbf16, #tpu.memory_space<vmem>>, vector<1x256xbf16>
    tpu.vector_store %arg10[%c18_39, %c0_40], %1 {strides = array<i32>} : memref<36x256xbf16, #tpu.memory_space<vmem>>, vector<1x256xbf16>,
    %c35_41 = arith.constant 35 : index
    %c0_42 = arith.constant 0 : index
    %36 = vector.load %arg10[%c35_41, %c0_42] : memref<36x256xbf16, #tpu.memory_space<vmem>>, vector<1x256xbf16>
    tpu.vector_store %arg10[%c35_41, %c0_42], %1 {strides = array<i32>} : memref<36x256xbf16, #tpu.memory_space<vmem>>, vector<1x256xbf16>,
    %c0_43 = arith.constant 0 : index
    %c0_44 = arith.constant 0 : index
    %37 = vector.load %arg10[%c0_43, %c0_44] : memref<36x256xbf16, #tpu.memory_space<vmem>>, vector<34x256xbf16>
    %c0_45 = arith.constant 0 : index
    %c0_46 = arith.constant 0 : index
    %c0_47 = arith.constant 0 : index
    %38 = vector.load %arg4[%c0_45, %c0_46, %c0_47] : memref<3x256x512xbf16, #tpu.memory_space<vmem>>, vector<1x256x512xbf16>
    %39 = vector.shape_cast %38 : vector<1x256x512xbf16> to vector<256x512xbf16>
    %cst_48 = arith.constant dense<0.000000e+00> : vector<34x512xf32>
    %40 = tpu.matmul %37, %39, %cst_48 {dimension_numbers = #tpu.dot_dimension_numbers<[1], [0], [0], [1], [0, 0, 1, 1], [], []>} : vector<34x256xbf16>, vector<256x512xbf16>, vector<34x512xf32> -> vector<34x512xf32>
    %c1_49 = arith.constant 1 : index
    %c0_50 = arith.constant 0 : index
    %41 = vector.load %arg10[%c1_49, %c0_50] : memref<36x256xbf16, #tpu.memory_space<vmem>>, vector<34x256xbf16>
    %c1_51 = arith.constant 1 : index
    %c0_52 = arith.constant 0 : index
    %c0_53 = arith.constant 0 : index
    %42 = vector.load %arg4[%c1_51, %c0_52, %c0_53] : memref<3x256x512xbf16, #tpu.memory_space<vmem>>, vector<1x256x512xbf16>
    %43 = vector.shape_cast %42 : vector<1x256x512xbf16> to vector<256x512xbf16>
    %cst_54 = arith.constant dense<0.000000e+00> : vector<34x512xf32>
    %44 = tpu.matmul %41, %43, %cst_54 {dimension_numbers = #tpu.dot_dimension_numbers<[1], [0], [0], [1], [0, 0, 1, 1], [], []>} : vector<34x256xbf16>, vector<256x512xbf16>, vector<34x512xf32> -> vector<34x512xf32>
    %45 = arith.addf %40, %44 : vector<34x512xf32>
    %c2_55 = arith.constant 2 : index
    %c0_56 = arith.constant 0 : index
    %46 = vector.load %arg10[%c2_55, %c0_56] : memref<36x256xbf16, #tpu.memory_space<vmem>>, vector<34x256xbf16>
    %c2_57 = arith.constant 2 : index
    %c0_58 = arith.constant 0 : index
    %c0_59 = arith.constant 0 : index
    %47 = vector.load %arg4[%c2_57, %c0_58, %c0_59] : memref<3x256x512xbf16, #tpu.memory_space<vmem>>, vector<1x256x512xbf16>
    %48 = vector.shape_cast %47 : vector<1x256x512xbf16> to vector<256x512xbf16>
    %cst_60 = arith.constant dense<0.000000e+00> : vector<34x512xf32>
    %49 = tpu.matmul %46, %48, %cst_60 {dimension_numbers = #tpu.dot_dimension_numbers<[1], [0], [0], [1], [0, 0, 1, 1], [], []>} : vector<34x256xbf16>, vector<256x512xbf16>, vector<34x512xf32> -> vector<34x512xf32>
    %50 = arith.addf %45, %49 : vector<34x512xf32>
    %c0_61 = arith.constant 0 : index
    %c0_62 = arith.constant 0 : index
    %51 = vector.load %arg5[%c0_61, %c0_62] : memref<1x512xf32, #tpu.memory_space<vmem>>, vector<1x512xf32>
    %52 = vector.broadcast %51 : vector<1x512xf32> to vector<34x512xf32>
    %53 = arith.addf %50, %52 : vector<34x512xf32>
    %cst_63 = arith.constant 0.000000e+00 : f32
    %54 = vector.broadcast %cst_63 : f32 to vector<34x512xf32>
    %55 = arith.maximumf %53, %54 : vector<34x512xf32>
    %56 = vector.extract_strided_slice %55 {offsets = [0, 0], sizes = [16, 512], strides = [1, 1]} : vector<34x512xf32> to vector<16x512xf32>
    %cst_64 = arith.constant dense<0.000000e+00> : vector<512xf32>
    %57 = vector.multi_reduction <add>, %56, %cst_64 [0] : vector<16x512xf32> to vector<512xf32>
    %58 = vector.shape_cast %57 : vector<512xf32> to vector<1x512xf32>
    %c0_65 = arith.constant 0 : index
    %c0_66 = arith.constant 0 : index
    %59 = vector.load %arg11[%c0_65, %c0_66] : memref<2x512xf32, #tpu.memory_space<vmem>>, vector<1x512xf32>
    tpu.vector_store %arg11[%c0_65, %c0_66], %58 {strides = array<i32>} : memref<2x512xf32, #tpu.memory_space<vmem>>, vector<1x512xf32>,
    %60 = vector.extract_strided_slice %55 {offsets = [18, 0], sizes = [16, 512], strides = [1, 1]} : vector<34x512xf32> to vector<16x512xf32>
    %cst_67 = arith.constant dense<0.000000e+00> : vector<512xf32>
    %61 = vector.multi_reduction <add>, %60, %cst_67 [0] : vector<16x512xf32> to vector<512xf32>
    %62 = vector.shape_cast %61 : vector<512xf32> to vector<1x512xf32>
    %c1_68 = arith.constant 1 : index
    %c0_69 = arith.constant 0 : index
    %63 = vector.load %arg11[%c1_68, %c0_69] : memref<2x512xf32, #tpu.memory_space<vmem>>, vector<1x512xf32>
    tpu.vector_store %arg11[%c1_68, %c0_69], %62 {strides = array<i32>} : memref<2x512xf32, #tpu.memory_space<vmem>>, vector<1x512xf32>,
    %c0_70 = arith.constant 0 : index
    %c0_71 = arith.constant 0 : index
    %64 = vector.load %arg11[%c0_70, %c0_71] : memref<2x512xf32, #tpu.memory_space<vmem>>, vector<2x512xf32>
    %c0_72 = arith.constant 0 : index
    %c0_73 = arith.constant 0 : index
    %65 = vector.load %arg6[%c0_72, %c0_73] : memref<512x128xf32, #tpu.memory_space<vmem>>, vector<512x128xf32>
    %cst_74 = arith.constant dense<0.000000e+00> : vector<2x128xf32>
    %66 = tpu.matmul %64, %65, %cst_74 {dimension_numbers = #tpu.dot_dimension_numbers<[1], [0], [0], [1], [0, 0, 1, 1], [], []>} : vector<2x512xf32>, vector<512x128xf32>, vector<2x128xf32> -> vector<2x128xf32>
    %c0_75 = arith.constant 0 : index
    %c0_76 = arith.constant 0 : index
    %67 = vector.load %arg7[%c0_75, %c0_76] : memref<1x128xf32, #tpu.memory_space<vmem>>, vector<1x128xf32>
    %68 = vector.broadcast %67 : vector<1x128xf32> to vector<2x128xf32>
    %69 = arith.addf %66, %68 : vector<2x128xf32>
    %c0_77 = arith.constant 0 : index
    %c0_78 = arith.constant 0 : index
    %c0_79 = arith.constant 0 : index
    %70 = vector.load %arg8[%c0_77, %c0_78, %c0_79] : memref<1x2x128xf32, #tpu.memory_space<vmem>>, vector<1x2x128xf32>
    %71 = vector.shape_cast %70 : vector<1x2x128xf32> to vector<2x128xf32>
    %72 = vector.shape_cast %69 : vector<2x128xf32> to vector<1x2x128xf32>
    tpu.vector_store %arg8[%c0_77, %c0_78, %c0_79], %72 {strides = array<i32>} : memref<1x2x128xf32, #tpu.memory_space<vmem>>, vector<1x2x128xf32>,
    return
  }
  func.func @transform_0(%arg0: i32) -> (i32, i32, i32) {
    %c0_i32 = arith.constant 0 : i32
    %c0_i32_0 = arith.constant 0 : i32
    %c0_i32_1 = arith.constant 0 : i32
    return %arg0, %c0_i32, %c0_i32_0 : i32, i32, i32
  }
  func.func @transform_1(%arg0: i32) -> (i32, i32, i32) {
    %c0_i32 = arith.constant 0 : i32
    %c0_i32_0 = arith.constant 0 : i32
    %c0_i32_1 = arith.constant 0 : i32
    %c0_i32_2 = arith.constant 0 : i32
    return %c0_i32, %c0_i32_0, %c0_i32_1 : i32, i32, i32
  }
  func.func @transform_2(%arg0: i32) -> (i32, i32) {
    %c0_i32 = arith.constant 0 : i32
    %c0_i32_0 = arith.constant 0 : i32
    %c0_i32_1 = arith.constant 0 : i32
    return %c0_i32, %c0_i32_0 : i32, i32
  }
  func.func @transform_3(%arg0: i32) -> (i32, i32, i32) {
    %c0_i32 = arith.constant 0 : i32
    %c0_i32_0 = arith.constant 0 : i32
    %c0_i32_1 = arith.constant 0 : i32
    %c0_i32_2 = arith.constant 0 : i32
    return %c0_i32, %c0_i32_0, %c0_i32_1 : i32, i32, i32
  }
  func.func @transform_4(%arg0: i32) -> (i32, i32) {
    %c0_i32 = arith.constant 0 : i32
    %c0_i32_0 = arith.constant 0 : i32
    %c0_i32_1 = arith.constant 0 : i32
    return %c0_i32, %c0_i32_0 : i32, i32
  }
  func.func @transform_5(%arg0: i32) -> (i32, i32) {
    %c0_i32 = arith.constant 0 : i32
    %c0_i32_0 = arith.constant 0 : i32
    %c0_i32_1 = arith.constant 0 : i32
    return %c0_i32, %c0_i32_0 : i32, i32
  }
  func.func @transform_6(%arg0: i32) -> (i32, i32) {
    %c0_i32 = arith.constant 0 : i32
    %c0_i32_0 = arith.constant 0 : i32
    %c0_i32_1 = arith.constant 0 : i32
    return %c0_i32, %c0_i32_0 : i32, i32
  }
  func.func @transform_7(%arg0: i32) -> (i32, i32, i32) {
    %c0_i32 = arith.constant 0 : i32
    %c0_i32_0 = arith.constant 0 : i32
    %c0_i32_1 = arith.constant 0 : i32
    return %arg0, %c0_i32, %c0_i32_0 : i32, i32, i32
  }
}

</mosaic_0001>

<bundles_post_ra>
// kernel: classification_model_forward.1
= control target key start
LH: loop header
LB: loop body
LE: loop exit
PB: predicated region body
PF: predicated region fallthrough
CT: control target
= control target key end

     0   :  { %12 = vsyncpa [#allocation6], 0  ;;  %s4590_s0 = inlined_call_operand.vmem [shape: bf16[2,16,128], index: 0, kind: input, shape index: {}]   ;;  %s4591_s1 = inlined_call_operand.hbm [shape: bf16[3,128,256], index: 1, kind: input, shape index: {}]   ;;  %s4592_s2 = inlined_call_operand.vmem [shape: f32[1,256], index: 2, kind: input, shape index: {}]   ;;  %s4593_s3 = inlined_call_operand.hbm [shape: bf16[3,256,512], index: 3, kind: input, shape index: {}]   ;;  %s4594_s4 = inlined_call_operand.vmem [shape: f32[1,512], index: 4, kind: input, shape index: {}]   ;;  %s4595_s5 = inlined_call_operand.vmem [shape: f32[512,128], index: 5, kind: input, shape index: {}]   ;;  %s4596_s6 = inlined_call_operand.vmem [shape: f32[1,128], index: 6, kind: input, shape index: {}]   ;;  %s4597_s7 = inlined_call_operand.hbm [shape: f32[1,2,128], index: 7, kind: output, shape index: {}]  }
   0x1   :  { %13 = vsyncpa [#allocation9], 0 }
   0x2   :  { %14 = vsyncpa [#allocation7], 0  ;;  %s3874_s24 = smov [#allocation5]   ;;  %s3802_s28 = scalar_lea.hbm %s4591_s1, 6144 }
   0x3   :  { %s22_s25 = sshll.u32 %s3874_s24, 4  ;;  %p3803_p0 = scmp.ne.s32.totalorder %s4591_s1, %s3802_s28  ;;  %s23_s25 = int_to_ptr.vmem [resolvable:$true] %s22_s25 }
   0x4   :  { %p3806_p1 = scmp.lt.u32.totalorder %s3802_s28, %s4591_s1 }
   0x6   :  { %p3808_p2 = pnand %p3806_p1, %p3803_p0 }
   0x8   :  { %3811 = shalt.err (!%p3808_p2)
}
   0x9   :  { %s3812_s10 = scalar_lea.vmem %s23_s25, 6144  ;;  %p3817_p4 = scmp.lt.s32.totalorder %s23_s25, %s23_s25 }
   0xa   :  { %p3813_p3 = scmp.ne.s32.totalorder %s23_s25, %s3812_s10  ;;  %p3818_p5 = scmp.lt.s32.totalorder %s3812_s10, %s3812_s10 }
   0xc   :  { %p3819_p6 = por %p3818_p5, %p3817_p4 }
   0xe   :  { %p3820_p7 = pnand %p3819_p6, %p3813_p3 }
  0x10   :  { %3823 = shalt.err (!%p3820_p7)
}
  0x11   :  { %s3875_s11 = smov 128   ;;  %s3876_s12 = smov 8  }
  0x12   :  { %28 = dma.hbm_to_vmem [thread:$0]  %s4591_s1, 6144, %s23_s25, [#allocation6], %s3875_s11, %s3875_s11, %s3876_s12  }
  0x13   :  { %s3877_s15 = smov [#allocation8]   ;;  %s3824_s19 = scalar_lea.hbm %s4593_s3, 24576 }
  0x14   :  { %s36_s16 = sshll.u32 %s3877_s15, 4  ;;  %p3825_p8 = scmp.ne.s32.totalorder %s4593_s3, %s3824_s19  ;;  %s37_s16 = int_to_ptr.vmem [resolvable:$true] %s36_s16 }
  0x15   :  { %p3828_p9 = scmp.lt.u32.totalorder %s3824_s19, %s4593_s3 }
  0x17   :  { %p3830_p10 = pnand %p3828_p9, %p3825_p8 }
  0x19   :  { %3833 = shalt.err (!%p3830_p10)
}
  0x1a   :  { %s3834_s24 = scalar_lea.vmem %s37_s16, 24576  ;;  %p3839_p12 = scmp.lt.s32.totalorder %s37_s16, %s37_s16 }
  0x1b   :  { %p3835_p11 = scmp.ne.s32.totalorder %s37_s16, %s3834_s24  ;;  %p3840_p13 = scmp.lt.s32.totalorder %s3834_s24, %s3834_s24 }
  0x1d   :  { %p3841_p0 = por %p3840_p13, %p3839_p12 }
  0x1f   :  { %p3842_p1 = pnand %p3841_p0, %p3835_p11 }
  0x21   :  { %3845 = shalt.err (!%p3842_p1)
}
  0x22   :  { %s3878_s1 = smov 256   ;;  %s3879_s25 = smov 16  }
  0x23   :  { %42 = dma.hbm_to_vmem [thread:$0]  %s4593_s3, 24576, %s37_s16, [#allocation9], %s3878_s1, %s3878_s1, %s3879_s25  }
  0x24   :  { %3868 = dma.done.wait [#allocation6], 6144  }
  0x25   :  { %3869 = vsyncadd [#allocation6], 4294961152 }
  0x26   :  { %3870 = dma.done.wait [#allocation9], 24576  }
  0x27   :  { %3871 = vsyncadd [#allocation9], 4294942720  ;;  %v3880_v0 = vmov 0   ;;  %v3432_v1 = vld [vmem:[#allocation5 + $0x84] ss:$8 sps:$4 sm:$0xff]   ;;  %vm56_vm0 = vcmask 1040384  }
  0x28   :  { %340 = vmatprep.mubr.bf16.mxu0 %v3880_v0  ;;  %v3434_v2 = vld [vmem:[#allocation5 + $0x80] ss:$8 sps:$4 sm:$0xff]   ;;  %308 = vmatprep.subr.bf16.mxu0 %v3432_v1  ;;  %v3435_v3 = vld [vmem:[#allocation5 + $0x94] ss:$8 sps:$4 sm:$0xff]   ;;  %v3437_v4 = vld [vmem:[#allocation5 + $0x90] ss:$8 sps:$4 sm:$0xff]  }
  0x29   :  { %309 = vmatpush1.bf16.msra.mxu0 %v3434_v2  ;;  %v3438_v5 = vld [vmem:[#allocation5 + $0xa4] ss:$8 sps:$4 sm:$0xff]   ;;  %vm57_vm1 = vsmask.f32 256  ;;  %v3440_v6 = vld [vmem:[#allocation5 + $0xa0] ss:$8 sps:$4 sm:$0xff]  }
  0x2a   :  { %310 = vmatprep.subr.bf16.mxu0 %v3435_v3  ;;  %vm100_vm2 = vcmask 1041409   ;;  %vm101_vm3 = vsmask.f32 1280  ;;  %v3441_v7 = vld [vmem:[#allocation5 + $0xb4] ss:$8 sps:$4 sm:$0xff]   ;;  %vm3951_vm5 = vmand %vm56_vm0, %vm57_vm1  ;;  %vm86_vm6 = vcmask 1043456  }
  0x2b   :  { %vm64_vm4 = vsmask.f32 4368  ;;  %vm87_vm7 = vsmask.f32 7938  ;;  %vm3957_vm8 = vmand %vm100_vm2, %vm101_vm3  ;;  %vm109_vm9 = vsmask.f32 5392 }
  0x2c   :  { %vm133_vm10 = vcmask 1043457   ;;  %vm134_vm11 = vsmask.f32 7942  ;;  %v3443_v10 = vld [vmem:[#allocation5 + $0xb0] ss:$8 sps:$4 sm:$0xff]   ;;  %vm140_vm12 = vcmask 1041408   ;;  %vm3979_vm13 = vmor %vm57_vm1, %vm64_vm4 }
  0x2d   :  { %311 = vmatpush1.bf16.msra.mxu0 %v3437_v4  ;;  %v3444_v11 = vld [vmem:[#allocation5 + $0xc4] ss:$8 sps:$4 sm:$0xff]   ;;  %v59_v12 = vld [vmem:[#allocation2] sm:$0x1]  ;;  %v63_v14 = vld [vmem:[%s4590_s0 + $0x4] sm:$0xf] }
  0x2e   :  { %312 = vmatprep.subr.bf16.mxu0 %v3438_v5  ;;  %v62_v13 = vld [vmem:[%s4590_s0] sm:$0xf]  ;;  %v3446_v15 = vld [vmem:[#allocation5 + $0xc0] ss:$8 sps:$4 sm:$0xff]   ;;  %v60_v16 = vsel %vm3951_vm5, 0, %v59_v12  ;;  %v75_v19 = vshrl.u32 %v63_v14, 16  ;;  %vm3985_vm14 = vmand %vm86_vm6, %vm87_vm7 }
  0x2f   :  { %v67_v17 = vshrl.u32 %v62_v13, 16  ;;  %v70_v18 = vshll.u32 %v62_v13, 16  ;;  %v3447_v20 = vld [vmem:[#allocation5 + $0xd4] ss:$8 sps:$4 sm:$0xff]   ;;  %61 = vst [vmem:[#allocation2] sm:$0x1] %v60_v16  ;;  %vm3991_vm15 = vmor %vm101_vm3, %vm109_vm9 }
  0x30   :  { %v78_v21 = vshll.u32 %v63_v14, 16  ;;  %v103_v22 = vld [vmem:[#allocation2 + $0x8] sm:$0x2]  ;;  %v77_v25 = vrot.slane %v75_v19, 7  ;;  %v2973_v27 = vld [vmem:[%s4590_s0 + $0xc] sm:$0xf]  ;;  %vm4001_vm1 = vmand %vm133_vm10, %vm134_vm11 }
  0x31   :  { %313 = vmatpush1.bf16.msra.mxu0 %v3440_v6  ;;  %v2972_v23 = vld [vmem:[%s4590_s0 + $0x8] sm:$0xf]  ;;  %v69_v24 = vrot.slane %v67_v17, 7  ;;  %v104_v26 = vsel %vm3957_vm8, 0, %v103_v22  ;;  %v121_v32 = vshrl.u32 %v2973_v27, 16  ;;  %v124_v33 = vshll.u32 %v2973_v27, 16  ;;  %vm4007_vm4 = vmand %vm140_vm12, %vm101_vm3 }
  0x32   :  { %314 = vmatprep.subr.bf16.mxu0 %v3441_v7  ;;  %v112_v28 = vshrl.u32 %v2972_v23, 16  ;;  %v93_v30 = vld [vmem:[#allocation2 + $0x8] sm:$0x1]  ;;  %105 = vst [vmem:[#allocation2 + $0x8] sm:$0x2] %v104_v26  ;;  %v115_v31 = vshll.u32 %v2972_v23, 16  ;;  %v80_v36 = vor.u32 %v78_v21, %v77_v25  ;;  %vm4021_vm3 = vmand %vm56_vm0, %vm87_vm7 }
  0x33   :  { %v72_v34 = vor.u32 %v70_v18, %v69_v24  ;;  %v73_v35 = vrot.slane %v69_v24, 4  ;;  %v82_v37 = vrot.slane %v77_v25, 4  ;;  %v3449_v39 = vld [vmem:[#allocation5 + $0xd0] ss:$8 sps:$4 sm:$0xff]   ;;  %v123_v43 = vrot.slane %v121_v32, 6  ;;  %vm4029_vm0 = vmand %vm100_vm2, %vm134_vm11  ;;  %s3883_s8 = smov [#allocation10]  }
  0x34   :  { %v114_v41 = vrot.slane %v112_v28, 6  ;;  %v117_v42 = vrot.slane %v115_v31, 7  ;;  %v126_v44 = vrot.slane %v124_v33, 7  ;;  %v3450_v48 = vld [vmem:[#allocation5 + $0xe4] ss:$8 sps:$4 sm:$0xff]   ;;  %vm537_vm6 = vcmask 1046528  }
  0x35   :  { %315 = vmatpush1.bf16.msra.mxu0 %v3443_v10  ;;  %v81_v45 = vsel %vm3979_vm13, %v73_v35, %v80_v36  ;;  %v94_v46 = vsel %vm3951_vm5, %v82_v37, %v93_v30  ;;  %v142_v52 = vld [vmem:[#allocation2 + $0x10] sm:$0x3]  ;;  %v3452_v54 = vld [vmem:[#allocation5 + $0xe0] ss:$8 sps:$4 sm:$0xff]   ;;  %v3453_v59 = vld [vmem:[#allocation5 + $0xf4] ss:$8 sps:$4 sm:$0xff]  }
  0x36   :  { %316 = vmatprep.subr.bf16.mxu0 %v3444_v11  ;;  %92 = vst [vmem:[#allocation2 + $0x4] sm:$0xf] %v81_v45  ;;  %95 = vst [vmem:[#allocation2 + $0x8] sm:$0x1] %v94_v46  ;;  %v118_v49 = vor.u32 %v117_v42, %v114_v41  ;;  %v127_v50 = vor.u32 %v126_v44, %v123_v43  ;;  %v89_v53 = vld [vmem:[#allocation2] sm:$0xf] }
  0x37   :  { %v90_v55 = vsel %vm3985_vm14, %v72_v34, %v89_v53  ;;  %v3455_v1 = vld [vmem:[#allocation5 + $0xf0] ss:$8 sps:$4 sm:$0xff]   ;;  %v3458_v2 = vld [vmem:[#allocation5 + $0x4] ss:$8 sps:$4 sm:$0xff]   ;;  %v3456_v19 = vld [vmem:[#allocation5] ss:$8 sps:$4 sm:$0xff]  }
  0x38   :  { %v119_v56 = vrot.slane %v118_v49, 4  ;;  %v129_v57 = vrot.slane %v127_v50, 4  ;;  %91 = vst [vmem:[#allocation2] sm:$0xf] %v90_v55  ;;  %vm201_vm2 = vsmask.f32 7424 }
  0x39   :  { %317 = vmatpush1.bf16.msra.mxu0 %v3446_v15  ;;  %v136_v58 = vld [vmem:[#allocation2 + $0x8] sm:$0xe]  ;;  %v3463_v21 = vld [vmem:[#allocation5 + $0x14] ss:$8 sps:$4 sm:$0xff]   ;;  %v3461_v25 = vld [vmem:[#allocation5 + $0x10] ss:$8 sps:$4 sm:$0xff]  }
  0x3a   :  { %318 = vmatprep.subr.bf16.mxu0 %v3447_v20  ;;  %v128_v60 = vsel %vm3991_vm15, %v119_v56, %v127_v50  ;;  %v137_v61 = vsel %vm4001_vm1, %v118_v49, %v136_v58  ;;  %v143_v62 = vsel %vm4007_vm4, %v129_v57, %v142_v52  ;;  %v3466_v27 = vld [vmem:[#allocation5 + $0x24] ss:$8 sps:$4 sm:$0xff]   ;;  %v3464_v37 = vld [vmem:[#allocation5 + $0x20] ss:$8 sps:$4 sm:$0xff]   ;;  %v3467_v42 = vld [vmem:[#allocation5 + $0x30] ss:$8 sps:$4 sm:$0xff]  }
  0x3b   :  { %138 = vst [vmem:[#allocation2 + $0x8] sm:$0xe] %v137_v61  ;;  %139 = vst [vmem:[#allocation2 + $0xc] sm:$0xf] %v128_v60  ;;  %v3473_v43 = vld [vmem:[#allocation5 + $0x44] ss:$8 sps:$4 sm:$0xff]  }
  0x3c   :  { %144 = vst [vmem:[#allocation2 + $0x10] sm:$0x3] %v143_v62  ;;  %v3471_v45 = vld [vmem:[#allocation5 + $0x40] ss:$8 sps:$4 sm:$0xff]   ;;  %v3476_v46 = vld [vmem:[#allocation5 + $0x54] ss:$8 sps:$4 sm:$0xff]  }
  0x3d   :  { %319 = vmatpush1.bf16.msra.mxu0 %v3449_v39  ;;  %v97_v3 = vld [vmem:[#allocation2 + $0x8] sm:$0x1]  ;;  %v150_v5 = vld [vmem:[#allocation2 + $0x4] sm:$0xf]  ;;  %v3469_v39 = vld [vmem:[#allocation5 + $0x34] ss:$8 sps:$4 sm:$0xff]  }
  0x3e   :  { %320 = vmatprep.subr.bf16.mxu0 %v3450_v48  ;;  %v98_v4 = vsel %vm4021_vm3, 0, %v97_v3  ;;  %v3474_v48 = vld [vmem:[#allocation5 + $0x50] ss:$8 sps:$4 sm:$0xff]   ;;  %v3479_v49 = vld [vmem:[#allocation5 + $0x64] ss:$8 sps:$4 sm:$0xff]   ;;  %vm804_vm7 = vcmask 1047556  }
  0x3f   :  { %99 = vst [vmem:[#allocation2 + $0x8] sm:$0x1] %v98_v4  ;;  %v149_v6 = vld [vmem:[#allocation2] sm:$0xf]  ;;  %v3477_v50 = vld [vmem:[#allocation5 + $0x60] ss:$8 sps:$4 sm:$0xff]  }
  0x40   :  { %v4033_v10 = vcombine.low %v149_v6, %v150_v5  ;;  %v516_v26 = vld [vmem:[#allocation2] sm:$0xe]  ;;  %v3480_v53 = vld [vmem:[#allocation5 + $0x70] ss:$8 sps:$4 sm:$0xff]   ;;  %v3483_v55 = vld [vmem:[#allocation5 + $0x100] ss:$8 sps:$4 sm:$0xff]  }
  0x41   :  { %321 = vmatpush1.bf16.msra.mxu0 %v3452_v54  ;;  %v3010_v30 = vcombine.low %v516_v26, %v150_v5  ;;  %v3482_v52 = vld [vmem:[#allocation5 + $0x74] ss:$8 sps:$4 sm:$0xff]   ;;  %v3485_v54 = vld [vmem:[#allocation5 + $0x104] ss:$8 sps:$4 sm:$0xff]   ;;  %v3486_v57 = vld [vmem:[#allocation5 + $0x110] ss:$8 sps:$4 sm:$0xff]  }
  0x42   :  { %322 = vmatprep.subr.bf16.mxu0 %v3453_v59  ;;  %v205_v12 = vshll.u32 %v4033_v10, 16  ;;  %v203_v14 = vshrl.u32 %v4033_v10, 16  ;;  %v3488_v56 = vld [vmem:[#allocation5 + $0x114] ss:$8 sps:$4 sm:$0xff]   ;;  %v3491_v58 = vld [vmem:[#allocation5 + $0x124] ss:$8 sps:$4 sm:$0xff]  }
  0x43   :  { %v146_v11 = vld [vmem:[#allocation2 + $0x10] sm:$0x2]  ;;  %v4043_v23 = vld [vmem:[#allocation2 + $0x10] ss:$0 sps:$4 sm:$0x33]   ;;  %v538_v35 = vrot.slane %v3010_v30, 1 }
  0x44   :  { %v147_v13 = vsel %vm4029_vm0, 0, %v146_v11  ;;  %v207_v15 = vrot.slane %v205_v12, 1  ;;  %v218_v28 = vshll.u32 %v4043_v23, 16  ;;  %v541_v32 = vrot.slane %v4043_v23, 1  ;;  %v3489_v59 = vld [vmem:[#allocation5 + $0x120] ss:$8 sps:$4 sm:$0xff]  }
  0x45   :  { %323 = vmatpush1.bf16.msra.mxu0 %v3455_v1  ;;  %148 = vst [vmem:[#allocation2 + $0x10] sm:$0x2] %v147_v13  ;;  %v222_v44 = vshrl.u32 %v4043_v23, 16  ;;  %v3494_v60 = vld [vmem:[#allocation5 + $0x134] ss:$8 sps:$4 sm:$0xff]   ;;  %vm821_vm12 = vcmask 1044484  }
  0x46   :  { %455 = vmatprep.subr.bf16.mxu0 %v3458_v2  ;;  %v4039_v16 = vld [vmem:[#allocation2 + $0x8] sm:$0xff]   ;;  %v208_v17 = vor.u32 %v207_v15, %v203_v14  ;;  %v220_v34 = vrot.slane %v218_v28, 1  ;;  %v3492_v61 = vld [vmem:[#allocation5 + $0x130] ss:$8 sps:$4 sm:$0xff]   ;;  %v3501_v3 = vld [vmem:[#allocation5 + $0x154] ss:$8 sps:$4 sm:$0xff]  }
  0x47   :  { %v210_v18 = vshll.u32 %v4039_v16, 16  ;;  %v214_v22 = vshrl.u32 %v4039_v16, 16  ;;  %v539_v31 = vrot.slane %v4039_v16, 1  ;;  %v3498_v62 = vld [vmem:[#allocation5 + $0x144] ss:$8 sps:$4 sm:$0xff]   ;;  %s2962_s9 = sshll.u32 %s3883_s8, 4  ;;  %s2963_s9 = int_to_ptr.vmem [resolvable:$true] %s2962_s9 }
  0x48   :  { %v224_v47 = vor.u32 %v222_v44, %v220_v34  ;;  %v3495_v1 = vld [vmem:[#allocation2 + $0x10] ss:$0 sps:$4 sm:$0x11]   ;;  %v3496_v2 = vld [vmem:[#allocation5 + $0x140] ss:$8 sps:$4 sm:$0xff]   ;;  %p3851_p3 = scmp.lt.s32.totalorder %s2963_s9, %s2963_s9 }
  0x49   :  { %v212_v20 = vrot.slane %v210_v18, 1  ;;  %v4053_v36 = vsel %vm537_vm6, %v539_v31, %v541_v32  ;;  %v4056_v40 = vsel %vm537_vm6, %v538_v35, %v539_v31  ;;  %v3499_v4 = vld [vmem:[#allocation5 + $0x150] ss:$8 sps:$4 sm:$0xff]   ;;  %v3504_v5 = vld [vmem:[#allocation5 + $0x164] ss:$8 sps:$4 sm:$0xff]  }
  0x4a   :  { %v3502_v6 = vld [vmem:[#allocation5 + $0x160] ss:$8 sps:$4 sm:$0xff]   ;;  %v3505_v11 = vld [vmem:[#allocation5 + $0x170] ss:$8 sps:$4 sm:$0xff]   ;;  %v3509_v12 = vld [vmem:[#allocation8 + $0x4] ss:$16 sps:$4 sm:$0xff]  }
  0x4b   :  { %v213_v24 = vsel %vm201_vm2, %v208_v17, %v212_v20  ;;  %v216_v33 = vor.u32 %v214_v22, %v212_v20  ;;  %v3511_v13 = vld [vmem:[#allocation8] ss:$16 sps:$4 sm:$0xff]   ;;  %v3512_v14 = vld [vmem:[#allocation8 + $0x24] ss:$16 sps:$4 sm:$0xff]   ;;  %1826 = vmatprep.subr.bf16.mxu1 %v3509_v12  ;;  %vm805_vm9 = vsmask.f32 7954 }
  0x4c   :  { %341 = vmatmul.mubr.bf16.vlgmr.msra.gmra.mrb[0].mxu0 %v213_v24  ;;  %v3520_v15 = vld [vmem:[#allocation8 + $0x200] ss:$16 sps:$4 sm:$0xff]   ;;  %1827 = vmatpush1.bf16.msra.mxu1 %v3511_v13  ;;  %v3515_v18 = vld [vmem:[#allocation8 + $0x44] ss:$16 sps:$4 sm:$0xff]   ;;  %v3598_v13 = vld [vmem:[#allocation8 + $0xc] ss:$16 sps:$4 sm:$0xff]  }
  0x4d   :  { %456 = vmatpush1.bf16.msra.mxu0 %v3456_v19  ;;  %350 = vmatprep.mubr.bf16.mxu0 %v3880_v0  ;;  %v221_v41 = vsel %vm201_vm2, %v216_v33, %v220_v34  ;;  %v3514_v17 = vld [vmem:[#allocation8 + $0x20] ss:$16 sps:$4 sm:$0xff]   ;;  %v3518_v20 = vld [vmem:[#allocation8 + $0x64] ss:$16 sps:$4 sm:$0xff]   ;;  %vm4092_vm10 = vmand %vm804_vm7, %vm805_vm9  ;;  %vm822_vm15 = vsmask.f32 4352 }
  0x4e   :  { %457 = vmatprep.subr.bf16.mxu0 %v3463_v21  ;;  %1828 = vmatprep.subr.bf16.mxu1 %v3512_v14  ;;  %v3517_v19 = vld [vmem:[#allocation8 + $0x40] ss:$16 sps:$4 sm:$0xff]   ;;  %v3524_v21 = vld [vmem:[#allocation8 + $0x84] ss:$16 sps:$4 sm:$0xff]   ;;  %vm807_vm11 = vmor %vm4092_vm10, %vm3985_vm14  ;;  %vm815_vm7 = vsmask.f32 5376 }
  0x4f   :  { %v3528_v22 = vld [vmem:[#allocation8 + $0x224] ss:$16 sps:$4 sm:$0xff]   ;;  %v3529_v23 = vld [vmem:[#allocation8 + $0x80] ss:$16 sps:$4 sm:$0xff]   ;;  %vm4107_vm14 = vmand %vm821_vm12, %vm822_vm15  ;;  %vm833_vm10 = vcmask 1045509  }
  0x50   :  { %1829 = vmatpush1.bf16.msra.mxu1 %v3514_v17  ;;  %v3526_v24 = vld [vmem:[#allocation8 + $0x220] ss:$16 sps:$4 sm:$0xff]   ;;  %v3534_v26 = vld [vmem:[#allocation8 + $0x244] ss:$16 sps:$4 sm:$0xff]   ;;  %vm824_vm1 = vmor %vm4107_vm14, %vm3951_vm5  ;;  %vm814_vm5 = vcmask 1045508  }
  0x51   :  { %458 = vmatpush1.bf16.msra.mxu0 %v3461_v25  ;;  %1830 = vmatprep.subr.bf16.mxu1 %v3515_v18  ;;  %v3530_v25 = vld [vmem:[#allocation8 + $0xa4] ss:$16 sps:$4 sm:$0xff]   ;;  %v3532_v28 = vld [vmem:[#allocation8 + $0x240] ss:$16 sps:$4 sm:$0xff]   ;;  %vm4127_vm15 = vmand %vm833_vm10, %vm815_vm7 }
  0x52   :  { %459 = vmatprep.subr.bf16.mxu0 %v3466_v27  ;;  %v3535_v27 = vld [vmem:[#allocation8 + $0xa0] ss:$16 sps:$4 sm:$0xff]   ;;  %v3536_v30 = vld [vmem:[#allocation8 + $0xc4] ss:$16 sps:$4 sm:$0xff]   ;;  %vm835_vm14 = vmor %vm4127_vm15, %vm3957_vm8  ;;  %vm839_vm8 = vsmask.f32 7958 }
  0x53   :  { %v3540_v31 = vld [vmem:[#allocation8 + $0x264] ss:$16 sps:$4 sm:$0xff]   ;;  %v3538_v33 = vld [vmem:[#allocation8 + $0x260] ss:$16 sps:$4 sm:$0xff]   ;;  %v3602_v29 = vld [vmem:[#allocation8 + $0x28] ss:$16 sps:$4 sm:$0xff]  }
  0x54   :  { %351 = vmatmul.mubr.bf16.gmra.mrb[4].mxu0 %v221_v41  ;;  %1831 = vmatpush1.bf16.msra.mxu1 %v3517_v19  ;;  %v3542_v34 = vld [vmem:[#allocation8 + $0xe4] ss:$16 sps:$4 sm:$0xff]   ;;  %v3553_v41 = vld [vmem:[#allocation8 + $0x100] ss:$16 sps:$4 sm:$0xff]   ;;  %v3621_v8 = vld [vmem:[#allocation8 + $0x88] ss:$16 sps:$4 sm:$0xff]  }
  0x55   :  { %460 = vmatpush1.bf16.msra.mxu0 %v3464_v37  ;;  %360 = vmatprep.mubr.bf16.mxu0 %v3880_v0  ;;  %v3546_v35 = vld [vmem:[#allocation8 + $0x284] ss:$16 sps:$4 sm:$0xff]   ;;  %v3544_v37 = vld [vmem:[#allocation8 + $0x280] ss:$16 sps:$4 sm:$0xff]  }
  0x56   :  { %461 = vmatprep.subr.bf16.mxu0 %v3469_v39  ;;  %1832 = vmatprep.subr.bf16.mxu1 %v3518_v20  ;;  %v3548_v39 = vld [vmem:[#allocation8 + $0x104] ss:$16 sps:$4 sm:$0xff]   ;;  %v3592_v12 = vld [vmem:[#allocation8 + $0x380] ss:$16 sps:$4 sm:$0xff]   ;;  %v3620_v20 = vld [vmem:[#allocation8 + $0x20c] ss:$16 sps:$4 sm:$0xff]  }
  0x57   :  { %v3558_v44 = vld [vmem:[#allocation8 + $0x2c4] ss:$16 sps:$4 sm:$0xff]   ;;  %v3605_v17 = vld [vmem:[#allocation8 + $0x3c0] ss:$16 sps:$4 sm:$0xff]  }
  0x58   :  { %v3601_v14 = vld [vmem:[#allocation8 + $0x3a4] ss:$16 sps:$4 sm:$0xff]   ;;  %v3611_v19 = vld [vmem:[#allocation8 + $0x3e0] ss:$16 sps:$4 sm:$0xff]  }
  0x59   :  { %462 = vmatpush1.bf16.msra.mxu0 %v3467_v42  ;;  %v3550_v42 = vld [vmem:[#allocation8 + $0x2a0] ss:$16 sps:$4 sm:$0xff]   ;;  %v3613_v18 = vld [vmem:[#allocation8 + $0x3e4] ss:$16 sps:$4 sm:$0xff]  }
  0x5a   :  { %463 = vmatprep.subr.bf16.mxu0 %v3473_v43  ;;  %v3554_v43 = vld [vmem:[#allocation8 + $0x124] ss:$16 sps:$4 sm:$0xff]  }
  0x5c   :  { %361 = vmatmul.mubr.bf16.gmra.mrb[8].mxu0 %v224_v47  ;;  %v3560_v47 = vld [vmem:[#allocation8 + $0x144] ss:$16 sps:$4 sm:$0xff]  }
  0x5d   :  { %464 = vmatpush1.bf16.msra.mxu0 %v3471_v45  ;;  %487 = vmatprep.mubr.bf16.mxu0 %v3880_v0  ;;  %v3559_v45 = vld [vmem:[#allocation8 + $0x120] ss:$16 sps:$4 sm:$0xff]  }
  0x5e   :  { %465 = vmatprep.subr.bf16.mxu0 %v3476_v46  ;;  %v3556_v46 = vld [vmem:[#allocation8 + $0x2c0] ss:$16 sps:$4 sm:$0xff]  }
  0x61   :  { %466 = vmatpush1.bf16.msra.mxu0 %v3474_v48  ;;  %v3564_v48 = vld [vmem:[#allocation8 + $0x2e4] ss:$16 sps:$4 sm:$0xff]  }
  0x62   :  { %467 = vmatprep.subr.bf16.mxu0 %v3479_v49  ;;  %v3565_v49 = vld [vmem:[#allocation8 + $0x140] ss:$16 sps:$4 sm:$0xff]  }
  0x65   :  { %468 = vmatpush1.bf16.msra.mxu0 %v3477_v50  ;;  %v3562_v50 = vld [vmem:[#allocation8 + $0x2e0] ss:$16 sps:$4 sm:$0xff]  }
  0x66   :  { %469 = vmatprep.subr.bf16.mxu0 %v3482_v52  ;;  %v3566_v52 = vld [vmem:[#allocation8 + $0x164] ss:$16 sps:$4 sm:$0xff]  }
  0x69   :  { %470 = vmatpush1.bf16.msra.mxu0 %v3480_v53  ;;  %v3570_v53 = vld [vmem:[#allocation8 + $0x304] ss:$16 sps:$4 sm:$0xff]  }
  0x6a   :  { %626 = vmatprep.subr.bf16.mxu0 %v3485_v54  ;;  %v3571_v54 = vld [vmem:[#allocation8 + $0x160] ss:$16 sps:$4 sm:$0xff]  }
  0x6c   :  { %488 = vmatmul.mubr.bf16.vlgmr.msra.gmra.mrb[0].mxu0 %v4033_v10  ;;  %v3507_v10 = vld [vmem:[#allocation5 + $0x174] ss:$8 sps:$4 sm:$0xff]  }
  0x6d   :  { %627 = vmatpush1.bf16.msra.mxu0 %v3483_v55  ;;  %497 = vmatprep.mubr.bf16.mxu0 %v3880_v0  ;;  %v3568_v55 = vld [vmem:[#allocation8 + $0x300] ss:$16 sps:$4 sm:$0xff]  }
  0x6e   :  { %628 = vmatprep.subr.bf16.mxu0 %v3488_v56  ;;  %v3572_v56 = vld [vmem:[#allocation8 + $0x184] ss:$16 sps:$4 sm:$0xff]  }
  0x71   :  { %629 = vmatpush1.bf16.msra.mxu0 %v3486_v57  ;;  %v3576_v57 = vld [vmem:[#allocation8 + $0x324] ss:$16 sps:$4 sm:$0xff]  }
  0x72   :  { %630 = vmatprep.subr.bf16.mxu0 %v3491_v58  ;;  %v3577_v58 = vld [vmem:[#allocation8 + $0x180] ss:$16 sps:$4 sm:$0xff]  }
  0x74   :  { %498 = vmatmul.mubr.bf16.gmra.mrb[4].mxu0 %v4039_v16  ;;  %v3522_v16 = vld [vmem:[#allocation8 + $0x204] ss:$16 sps:$4 sm:$0xff]  }
  0x75   :  { %631 = vmatpush1.bf16.msra.mxu0 %v3489_v59  ;;  %507 = vmatprep.mubr.bf16.mxu0 %v3880_v0  ;;  %v3574_v59 = vld [vmem:[#allocation8 + $0x320] ss:$16 sps:$4 sm:$0xff]  }
  0x76   :  { %632 = vmatprep.subr.bf16.mxu0 %v3494_v60  ;;  %v3578_v60 = vld [vmem:[#allocation8 + $0x1a4] ss:$16 sps:$4 sm:$0xff]  }
  0x79   :  { %633 = vmatpush1.bf16.msra.mxu0 %v3492_v61  ;;  %v3582_v61 = vld [vmem:[#allocation8 + $0x344] ss:$16 sps:$4 sm:$0xff]  }
  0x7a   :  { %634 = vmatprep.subr.bf16.mxu0 %v3498_v62  ;;  %v3583_v62 = vld [vmem:[#allocation8 + $0x1a0] ss:$16 sps:$4 sm:$0xff]  }
  0x7c   :  { %508 = vmatmul.mubr.bf16.gmra.mrb[12].mxu0 %v3495_v1  ;;  %v3580_v1 = vld [vmem:[#allocation8 + $0x340] ss:$16 sps:$4 sm:$0xff]  }
  0x7d   :  { %635 = vmatpush1.bf16.msra.mxu0 %v3496_v2  ;;  %658 = vmatprep.mubr.bf16.mxu0 %v3880_v0  ;;  %v3584_v2 = vld [vmem:[#allocation8 + $0x1c4] ss:$16 sps:$4 sm:$0xff]  }
  0x7e   :  { %636 = vmatprep.subr.bf16.mxu0 %v3501_v3  ;;  %v3588_v3 = vld [vmem:[#allocation8 + $0x364] ss:$16 sps:$4 sm:$0xff]  }
  0x81   :  { %637 = vmatpush1.bf16.msra.mxu0 %v3499_v4  ;;  %v3589_v4 = vld [vmem:[#allocation8 + $0x1c0] ss:$16 sps:$4 sm:$0xff]  }
  0x82   :  { %638 = vmatprep.subr.bf16.mxu0 %v3504_v5  ;;  %v3586_v5 = vld [vmem:[#allocation8 + $0x360] ss:$16 sps:$4 sm:$0xff]  }
  0x85   :  { %639 = vmatpush1.bf16.msra.mxu0 %v3502_v6  ;;  %v3590_v6 = vld [vmem:[#allocation8 + $0x1e4] ss:$16 sps:$4 sm:$0xff]  }
  0x86   :  { %640 = vmatprep.subr.bf16.mxu0 %v3507_v10  ;;  %v3594_v10 = vld [vmem:[#allocation8 + $0x384] ss:$16 sps:$4 sm:$0xff]  }
  0x89   :  { %641 = vmatpush1.bf16.msra.mxu0 %v3505_v11  ;;  %v3595_v11 = vld [vmem:[#allocation8 + $0x1e0] ss:$16 sps:$4 sm:$0xff]  }
  0x8a   :  { %1373 = vmatprep.subr.bf16.mxu0 %v3522_v16  ;;  %v3607_v16 = vld [vmem:[#allocation8 + $0x3c4] ss:$16 sps:$4 sm:$0xff]  }
  0x8c   :  { %659 = vmatmul.mubr.bf16.vlgmr.msra.gmra.mrb[0].mxu0 %v4056_v40  ;;  %v3552_v40 = vld [vmem:[#allocation8 + $0x2a4] ss:$16 sps:$4 sm:$0xff]  }
  0x8d   :  { %668 = vmatprep.mubr.bf16.mxu0 %v3880_v0  ;;  %1374 = vmatpush1.bf16.msra.mxu0 %v3520_v15  ;;  %v3599_v15 = vld [vmem:[#allocation8 + $0x3a0] ss:$16 sps:$4 sm:$0xff]  }
  0x8e   :  { %1375 = vmatprep.subr.bf16.mxu0 %v3528_v22 }
  0x91   :  { %1376 = vmatpush1.bf16.msra.mxu0 %v3526_v24 }
  0x92   :  { %1377 = vmatprep.subr.bf16.mxu0 %v3534_v26 }
  0x94   :  { %669 = vmatmul.mubr.bf16.gmra.mrb[4].mxu0 %v4053_v36  ;;  %v3547_v36 = vld [vmem:[#allocation8 + $0xe0] ss:$16 sps:$4 sm:$0xff]  }
  0x95   :  { %678 = vmatprep.mubr.bf16.mxu0 %v3880_v0  ;;  %v3523_v0 = vld [vmem:[#allocation8 + $0x60] ss:$16 sps:$4 sm:$0xff]   ;;  %1378 = vmatpush1.bf16.msra.mxu0 %v3532_v28 }
  0x96   :  { %1833 = vmatpush1.bf16.msra.mxu1 %v3523_v0  ;;  %1379 = vmatprep.subr.bf16.mxu0 %v3540_v31 }
  0x97   :  { %1834 = vmatprep.subr.bf16.mxu1 %v3524_v21 }
  0x99   :  { %1380 = vmatpush1.bf16.msra.mxu0 %v3538_v33 }
  0x9a   :  { %1835 = vmatpush1.bf16.msra.mxu1 %v3529_v23  ;;  %1381 = vmatprep.subr.bf16.mxu0 %v3546_v35 }
  0x9b   :  { %1836 = vmatprep.subr.bf16.mxu1 %v3530_v25 }
  0x9c   :  { %679 = vmatmul.mubr.bf16.gmra.mrb[16].mxu0 %v541_v32  ;;  %v3541_v32 = vld [vmem:[#allocation8 + $0xc0] ss:$16 sps:$4 sm:$0xff]  }
  0x9d   :  { %1382 = vmatpush1.bf16.msra.mxu0 %v3544_v37 }
  0x9e   :  { %1837 = vmatpush1.bf16.msra.mxu1 %v3535_v27  ;;  %1383 = vmatprep.subr.bf16.mxu0 %v3552_v40  ;;  %v699_v27 = vlaneseq }
  0x9f   :  { %1838 = vmatprep.subr.bf16.mxu1 %v3536_v30 }
  0xa1   :  { %1384 = vmatpush1.bf16.msra.mxu0 %v3550_v42 }
  0xa2   :  { %1839 = vmatpush1.bf16.msra.mxu1 %v3541_v32  ;;  %1385 = vmatprep.subr.bf16.mxu0 %v3558_v44  ;;  %v4076_v32 = vshrl.u32 %v699_v27, 7 }
  0xa3   :  { %1840 = vmatprep.subr.bf16.mxu1 %v3542_v34  ;;  %v697_v34 = vld [vmem:[%s4592_s2] sm:$0x3] }
  0xa4   :  { %v701_v33 = vsub.s32 0, %v4076_v32  ;;  %v705_v35 = vsub.s32 1, %v4076_v32 }
  0xa5   :  { %1386 = vmatpush1.bf16.msra.mxu0 %v3556_v46 }
  0xa6   :  { %1841 = vmatpush1.bf16.msra.mxu1 %v3547_v36  ;;  %1387 = vmatprep.subr.bf16.mxu0 %v3564_v48  ;;  %v702_v36 = vrot.slane %v697_v34, %v701_v33  ;;  %v4087_v37 = vrot.slane %v697_v34, %v705_v35 }
  0xa7   :  { %1842 = vmatprep.subr.bf16.mxu1 %v3548_v39 }
  0xa9   :  { %1388 = vmatpush1.bf16.msra.mxu0 %v3562_v50 }
  0xaa   :  { %1843 = vmatpush1.bf16.msra.mxu1 %v3553_v41  ;;  %1389 = vmatprep.subr.bf16.mxu0 %v3570_v53 }
  0xab   :  { %1844 = vmatprep.subr.bf16.mxu1 %v3554_v43 }
  0xad   :  { %1390 = vmatpush1.bf16.msra.mxu0 %v3568_v55 }
  0xae   :  { %1845 = vmatpush1.bf16.msra.mxu1 %v3559_v45  ;;  %1391 = vmatprep.subr.bf16.mxu0 %v3576_v57 }
  0xaf   :  { %1846 = vmatprep.subr.bf16.mxu1 %v3560_v47 }
  0xb1   :  { %1392 = vmatpush1.bf16.msra.mxu0 %v3574_v59 }
  0xb2   :  { %1847 = vmatpush1.bf16.msra.mxu1 %v3565_v49  ;;  %1393 = vmatprep.subr.bf16.mxu0 %v3582_v61 }
  0xb3   :  { %1848 = vmatprep.subr.bf16.mxu1 %v3566_v52 }
  0xb5   :  { %1394 = vmatpush1.bf16.msra.mxu0 %v3580_v1 }
  0xb6   :  { %1849 = vmatpush1.bf16.msra.mxu1 %v3571_v54  ;;  %1395 = vmatprep.subr.bf16.mxu0 %v3588_v3 }
  0xb7   :  { %1850 = vmatprep.subr.bf16.mxu1 %v3572_v56 }
  0xb9   :  { %1396 = vmatpush1.bf16.msra.mxu0 %v3586_v5 }
  0xba   :  { %1851 = vmatpush1.bf16.msra.mxu1 %v3577_v58  ;;  %1397 = vmatprep.subr.bf16.mxu0 %v3594_v10 }
  0xbb   :  { %1852 = vmatprep.subr.bf16.mxu1 %v3578_v60 }
  0xbd   :  { %1398 = vmatpush1.bf16.msra.mxu0 %v3592_v12 }
  0xbe   :  { %1853 = vmatpush1.bf16.msra.mxu1 %v3583_v62  ;;  %1399 = vmatprep.subr.bf16.mxu0 %v3601_v14 }
  0xbf   :  { %1854 = vmatprep.subr.bf16.mxu1 %v3584_v2  ;;  %v808_v2 = vld [vmem:[#allocation3] sm:$0xff] }
  0xc1   :  { %1400 = vmatpush1.bf16.msra.mxu0 %v3599_v15 }
  0xc2   :  { %1855 = vmatpush1.bf16.msra.mxu1 %v3589_v4  ;;  %1401 = vmatprep.subr.bf16.mxu0 %v3607_v16 }
  0xc3   :  { %1856 = vmatprep.subr.bf16.mxu1 %v3590_v6 }
  0xc5   :  { %1402 = vmatpush1.bf16.msra.mxu0 %v3605_v17 }
  0xc6   :  { %1857 = vmatpush1.bf16.msra.mxu1 %v3595_v11  ;;  %1403 = vmatprep.subr.bf16.mxu0 %v3613_v18 }
  0xc7   :  { %1887 = vmatprep.subr.bf16.mxu1 %v3598_v13 }
  0xc9   :  { %1404 = vmatpush1.bf16.msra.mxu0 %v3611_v19 }
  0xca   :  { %1434 = vmatprep.subr.bf16.mxu0 %v3620_v20 }
 0x12f   :  { %v362_v0 = vpop.f32.mrb[8].mxu0 }
 0x130   :  { %v364_v21 = vpop.f32.mrb[9].mxu0 }
 0x131   :  { %v366_v22 = vpop.f32.mrb[10].mxu0 }
 0x132   :  { %v367_v23 = vpop.f32.mrb[11].mxu0 }
 0x14f   :  { %v509_v24 = vpop.f32.mrb[12].mxu0 }
 0x150   :  { %v510_v25 = vadd.f32 %v509_v24, %v362_v0  ;;  %v511_v26 = vpop.f32.mrb[13].mxu0 }
 0x151   :  { %v4073_v28 = vadd.f32 %v511_v26, %v364_v21  ;;  %v513_v30 = vpop.f32.mrb[14].mxu0 }
 0x152   :  { %v514_v31 = vpop.f32.mrb[15].mxu0 }
 0x15f   :  { %v660_v39 = vpop.f32.mrb[0].mxu0 }
 0x160   :  { %v709_v40 = vadd.f32 %v702_v36, %v660_v39  ;;  %v662_v41 = vpop.f32.mrb[1].mxu0 }
 0x161   :  { %v710_v42 = vadd.f32 %v4087_v37, %v662_v41  ;;  %v664_v43 = vpop.f32.mrb[2].mxu0 }
 0x162   :  { %v719_v44 = vmax.f32 %v709_v40, 0.0  ;;  %v711_v45 = vadd.f32 %v702_v36, %v664_v43  ;;  %v666_v46 = vpop.f32.mrb[3].mxu0 }
 0x163   :  { %v720_v47 = vmax.f32 %v710_v42, 0.0  ;;  %v712_v48 = vadd.f32 %v4087_v37, %v666_v46 }
 0x164   :  { %v721_v49 = vmax.f32 %v711_v45, 0.0 }
 0x165   :  { %v3235_v50 = vpack.c.bf16 %v720_v47, %v719_v44  ;;  %v722_v52 = vmax.f32 %v712_v48, 0.0 }
 0x167   :  { %v757_v53 = vshrl.u32 %v3235_v50, 16  ;;  %v3236_v55 = vpack.c.bf16 %v722_v52, %v721_v49  ;;  %v670_v56 = vpop.f32.mrb[4].mxu0  ;;  %v760_v60 = vshll.u32 %v3235_v50, 16  ;;  %v3633_v52 = vld [vmem:[#allocation8 + $0x24c] ss:$16 sps:$4 sm:$0xff]  }
 0x168   :  { %v713_v57 = vadd.f32 %v702_v36, %v670_v56  ;;  %v672_v58 = vpop.f32.mrb[5].mxu0 }
 0x169   :  { %v759_v59 = vrot.slane %v757_v53, 7  ;;  %v765_v61 = vshrl.u32 %v3236_v55, 16  ;;  %v714_v62 = vadd.f32 %v4087_v37, %v672_v58  ;;  %v674_v1 = vpop.f32.mrb[6].mxu0  ;;  %v768_v11 = vshll.u32 %v3236_v55, 16  ;;  %v818_v58 = vld [vmem:[#allocation3 + $0x20] sm:$0x33] }
 0x16a   :  { %v723_v3 = vmax.f32 %v713_v57, 0.0  ;;  %v715_v4 = vadd.f32 %v702_v36, %v674_v1  ;;  %v676_v5 = vpop.f32.mrb[7].mxu0 }
 0x16b   :  { %v762_v6 = vor.u32 %v760_v60, %v759_v59  ;;  %v767_v10 = vrot.slane %v765_v61, 7  ;;  %v724_v12 = vmax.f32 %v714_v62, 0.0  ;;  %v716_v14 = vadd.f32 %v4087_v37, %v676_v5 }
 0x16c   :  { %v725_v13 = vmax.f32 %v715_v4, 0.0  ;;  %v763_v15 = vrot.slane %v759_v59, 4  ;;  %v3596_v4 = vld [vmem:[#allocation8 + $0x8] ss:$16 sps:$4 sm:$0xff]  }
 0x16d   :  { %v809_v16 = vsel %vm807_vm11, %v762_v6, %v808_v2  ;;  %v770_v17 = vor.u32 %v768_v11, %v767_v10  ;;  %v3237_v38 = vpack.c.bf16 %v724_v12, %v723_v3  ;;  %v726_v18 = vmax.f32 %v716_v14, 0.0  ;;  %vm4121_vm11 = vmand %vm821_vm12, %vm805_vm9  ;;  %v3604_v6 = vld [vmem:[#allocation8 + $0x2c] ss:$16 sps:$4 sm:$0xff]  }
 0x16e   :  { %810 = vst [vmem:[#allocation3] sm:$0xff] %v809_v16  ;;  %v772_v42 = vrot.slane %v767_v10, 4  ;;  %vm829_vm9 = vmor %vm4121_vm11, %vm4021_vm3  ;;  %v3610_v14 = vld [vmem:[#allocation8 + $0x4c] ss:$16 sps:$4 sm:$0xff]  }
 0x16f   :  { %v4104_v19 = vsel %vm3979_vm13, %v763_v15, %v770_v17  ;;  %v774_v20 = vshrl.u32 %v3237_v38, 16  ;;  %v680_v0 = vpop.f32.mrb[16].mxu0  ;;  %v3238_v22 = vpack.c.bf16 %v726_v18, %v725_v13  ;;  %v777_v30 = vshll.u32 %v3237_v38, 16  ;;  %vm4138_vm12 = vmand %vm814_vm5, %vm815_vm7  ;;  %v3608_v38 = vld [vmem:[#allocation8 + $0x48] ss:$16 sps:$4 sm:$0xff]  }
 0x170   :  { %v695_v23 = vadd.f32 %v680_v0, %v510_v25  ;;  %v682_v24 = vpop.f32.mrb[17].mxu0  ;;  %vm817_vm3 = vmor %vm4138_vm12, %vm4007_vm4 }
 0x171   :  { %v776_v26 = vrot.slane %v774_v20, 7  ;;  %v696_v31 = vadd.f32 %v682_v24, %v4073_v28  ;;  %v684_v34 = vpop.f32.mrb[18].mxu0  ;;  %v783_v39 = vshrl.u32 %v3238_v22, 16  ;;  %v786_v25 = vshll.u32 %v3238_v22, 16  ;;  %vm4161_vm4 = vmand %vm833_vm10, %vm839_vm8  ;;  %v3617_v20 = vld [vmem:[#allocation8 + $0x6c] ss:$16 sps:$4 sm:$0xff]  }
 0x172   :  { %v717_v40 = vadd.f32 %v702_v36, %v695_v23  ;;  %v685_v41 = vpop.f32.mrb[19].mxu0 }
 0x173   :  { %v779_v43 = vor.u32 %v777_v30, %v776_v26  ;;  %v718_v44 = vadd.f32 %v4087_v37, %v696_v31  ;;  %v785_v45 = vrot.slane %v783_v39, 7  ;;  %v781_v49 = vrot.slane %v776_v26, 4  ;;  %v3615_v41 = vld [vmem:[#allocation8 + $0x68] ss:$16 sps:$4 sm:$0xff]  }
 0x174   :  { %v727_v46 = vmax.f32 %v717_v40, 0.0 }
 0x175   :  { %v825_v47 = vld [vmem:[#allocation3] sm:$0x11]  ;;  %v780_v28 = vsel %vm3979_vm13, %v772_v42, %v779_v43  ;;  %v728_v36 = vmax.f32 %v718_v44, 0.0  ;;  %v788_v37 = vor.u32 %v786_v25, %v785_v45  ;;  %v790_v63 = vrot.slane %v785_v45, 4  ;;  %v4167_v13 = vld [vmem:[#allocation3] sm:$0xee] }
 0x176   :  { %v826_v48 = vsel %vm824_vm1, 0, %v825_v47  ;;  %812 = vst [vmem:[#allocation3 + $0x10] sm:$0xff] %v780_v28  ;;  %v3169_v16 = vcombine.high %v4167_v13, %v4104_v19  ;;  %v3618_v25 = vld [vmem:[#allocation8 + $0x208] ss:$16 sps:$4 sm:$0xff]  }
 0x177   :  { %827 = vst [vmem:[#allocation3] sm:$0x11] %v826_v48  ;;  %v3239_v50 = vpack.c.bf16 %v728_v36, %v727_v46  ;;  %v789_v53 = vsel %vm3979_vm13, %v781_v49, %v788_v37  ;;  %v3623_v46 = vld [vmem:[#allocation8 + $0x8c] ss:$16 sps:$4 sm:$0xff]   ;;  %v3624_v49 = vld [vmem:[#allocation8 + $0x228] ss:$16 sps:$4 sm:$0xff]  }
 0x178   :  { %v2022_v39 = vrot.slane %v3169_v16, 1  ;;  %v3626_v48 = vld [vmem:[#allocation8 + $0x22c] ss:$16 sps:$4 sm:$0xff]   ;;  %v3645_v16 = vld [vmem:[#allocation8 + $0x288] ss:$16 sps:$4 sm:$0xff]  }
 0x179   :  { %v792_v54 = vshrl.u32 %v3239_v50, 16  ;;  %v795_v57 = vshll.u32 %v3239_v50, 16  ;;  %v3630_v50 = vld [vmem:[#allocation8 + $0xac] ss:$16 sps:$4 sm:$0xff]  }
 0x17b   :  { %v794_v56 = vrot.slane %v792_v54, 7 }
 0x17d   :  { %v830_v59 = vld [vmem:[#allocation3 + $0x10] sm:$0x11]  ;;  %v836_v60 = vld [vmem:[#allocation3 + $0x10] sm:$0x22]  ;;  %v797_v61 = vor.u32 %v795_v57, %v794_v56  ;;  %v3628_v56 = vld [vmem:[#allocation8 + $0xa8] ss:$16 sps:$4 sm:$0xff]  }
 0x17e   :  { %v831_v62 = vsel %vm829_vm9, 0, %v830_v59  ;;  %v837_v1 = vsel %vm835_vm14, 0, %v836_v60  ;;  %v845_v2 = vld [vmem:[#allocation3] sm:$0xff]  ;;  %v3631_v57 = vld [vmem:[#allocation8 + $0x248] ss:$16 sps:$4 sm:$0xff]  }
 0x17f   :  { %832 = vst [vmem:[#allocation3 + $0x10] sm:$0x11] %v831_v62  ;;  %838 = vst [vmem:[#allocation3 + $0x10] sm:$0x22] %v837_v1  ;;  %v798_v9 = vsel %vm3979_vm13, %v790_v63, %v797_v61  ;;  %v4153_v3 = vcombine.high %v845_v2, %v4104_v19  ;;  %v4156_v5 = vcombine.low %v845_v2, %v4104_v19  ;;  %v3637_v60 = vld [vmem:[#allocation8 + $0xcc] ss:$16 sps:$4 sm:$0xff]  }
 0x180   :  { %v819_v51 = vsel %vm817_vm3, %v798_v9, %v818_v58  ;;  %vm841_vm13 = vmor %vm4161_vm4, %vm4029_vm0  ;;  %v3641_v1 = vld [vmem:[#allocation8 + $0x26c] ss:$16 sps:$4 sm:$0xff]   ;;  %vm2633_vm0 = vcmask 1045504  }
 0x181   :  { %820 = vst [vmem:[#allocation3 + $0x20] sm:$0x33] %v819_v51  ;;  %1858 = vmatprep.mubr.bf16.mxu1 %v4153_v3  ;;  %v1016_v11 = vshll.u32 %v4153_v3, 16  ;;  %v1004_v12 = vshll.u32 %v4156_v5, 16  ;;  %v1014_v7 = vshrl.u32 %v4153_v3, 16  ;;  %v1002_v24 = vshrl.u32 %v4156_v5, 16 }
 0x182   :  { %1859 = vmatmul.mubr.bf16.vlgmr.msra.gmra.mrb[0].mxu1 %v4156_v5  ;;  %v3635_v51 = vld [vmem:[#allocation8 + $0xc8] ss:$16 sps:$4 sm:$0xff]  }
 0x183   :  { %1888 = vmatpush1.bf16.msra.mxu1 %v3596_v4  ;;  %v1018_v0 = vrot.slane %v1016_v11, 1  ;;  %v1006_v21 = vrot.slane %v1004_v12, 1  ;;  %v3644_v12 = vld [vmem:[#allocation8 + $0xec] ss:$16 sps:$4 sm:$0xff]  }
 0x184   :  { %1889 = vmatprep.subr.bf16.mxu1 %v3604_v6 }
 0x185   :  { %v1019_v42 = vor.u32 %v1018_v0, %v1014_v7  ;;  %v1007_v44 = vor.u32 %v1006_v21, %v1002_v24  ;;  %v3648_v21 = vld [vmem:[#allocation8 + $0x108] ss:$16 sps:$4 sm:$0xff]   ;;  %v3656_v7 = vld [vmem:[#allocation8 + $0x12c] ss:$16 sps:$4 sm:$0xff]  }
 0x186   :  { %v847_v15 = vld [vmem:[#allocation3 + $0x10] sm:$0xff]  ;;  %v3659_v24 = vld [vmem:[#allocation8 + $0x2cc] ss:$16 sps:$4 sm:$0xff]  }
 0x187   :  { %1890 = vmatpush1.bf16.msra.mxu1 %v3602_v29  ;;  %v4175_v17 = vcombine.high %v847_v15, %v789_v53  ;;  %v4177_v18 = vcombine.low %v847_v15, %v789_v53  ;;  %v3639_v29 = vld [vmem:[#allocation8 + $0x268] ss:$16 sps:$4 sm:$0xff]  }
 0x188   :  { %v842_v22 = vld [vmem:[#allocation3 + $0x20] sm:$0x22]  ;;  %1891 = vmatprep.subr.bf16.mxu1 %v3610_v14  ;;  %v849_v23 = vld [vmem:[#allocation3 + $0x20] sm:$0x11]  ;;  %v3647_v14 = vld [vmem:[#allocation8 + $0x28c] ss:$16 sps:$4 sm:$0xff]  }
 0x189   :  { %v843_v26 = vsel %vm841_vm13, 0, %v842_v22  ;;  %1868 = vmatprep.mubr.bf16.mxu1 %v4175_v17  ;;  %v4182_v30 = vcombine.high %v849_v23, %v849_v23  ;;  %v1021_v31 = vshll.u32 %v4175_v17, 16  ;;  %v1009_v34 = vshll.u32 %v4177_v18, 16  ;;  %v3642_v15 = vld [vmem:[#allocation8 + $0xe8] ss:$16 sps:$4 sm:$0xff]  }
 0x18a   :  { %844 = vst [vmem:[#allocation3 + $0x20] sm:$0x22] %v843_v26  ;;  %1869 = vmatmul.mubr.bf16.gmra.mrb[4].mxu1 %v4177_v18  ;;  %v2023_v40 = vrot.slane %v4175_v17, 1  ;;  %v4202_v37 = vcombine.low %v849_v23, %v849_v23  ;;  %v1033_v58 = vshrl.u32 %v4175_v17, 16  ;;  %v1025_v63 = vshrl.u32 %v4177_v18, 16 }
 0x18b   :  { %1892 = vmatpush1.bf16.msra.mxu1 %v3608_v38  ;;  %1878 = vmatprep.mubr.bf16.mxu1 %v4182_v30  ;;  %v1023_v43 = vrot.slane %v1021_v31, 1  ;;  %v1011_v45 = vrot.slane %v1009_v34, 1  ;;  %v3650_v38 = vld [vmem:[#allocation8 + $0x10c] ss:$16 sps:$4 sm:$0xff]   ;;  %v3651_v23 = vld [vmem:[#allocation8 + $0x2a8] ss:$16 sps:$4 sm:$0xff]  }
 0x18c   :  { %1893 = vmatprep.subr.bf16.mxu1 %v3617_v20  ;;  %v4192_v47 = vsel %vm537_vm6, %v2022_v39, %v2023_v40  ;;  %v3653_v20 = vld [vmem:[#allocation8 + $0x2ac] ss:$16 sps:$4 sm:$0xff]   ;;  %v3654_v26 = vld [vmem:[#allocation8 + $0x128] ss:$16 sps:$4 sm:$0xff]  }
 0x18d   :  { %v4195_v28 = vsel %vm201_vm2, %v1019_v42, %v1023_v43  ;;  %v4198_v36 = vsel %vm201_vm2, %v1007_v44, %v1011_v45  ;;  %v1035_v62 = vor.u32 %v1033_v58, %v1023_v43  ;;  %v1027_v9 = vor.u32 %v1025_v63, %v1011_v45  ;;  %v3657_v31 = vld [vmem:[#allocation8 + $0x2c8] ss:$16 sps:$4 sm:$0xff]   ;;  %v3662_v34 = vld [vmem:[#allocation8 + $0x14c] ss:$16 sps:$4 sm:$0xff]  }
 0x18e   :  { %1405 = vmatprep.mubr.bf16.mxu0 %v4195_v28  ;;  %v3665_v39 = vld [vmem:[#allocation8 + $0x2ec] ss:$16 sps:$4 sm:$0xff]   ;;  %v3663_v42 = vld [vmem:[#allocation8 + $0x2e8] ss:$16 sps:$4 sm:$0xff]  }
 0x18f   :  { %1894 = vmatpush1.bf16.msra.mxu1 %v3615_v41  ;;  %1406 = vmatmul.mubr.bf16.vlgmr.msra.gmra.mrb[20].mxu0 %v4198_v36  ;;  %v3660_v41 = vld [vmem:[#allocation8 + $0x148] ss:$16 sps:$4 sm:$0xff]   ;;  %v3668_v43 = vld [vmem:[#allocation8 + $0x16c] ss:$16 sps:$4 sm:$0xff]  }
 0x190   :  { %1435 = vmatpush1.bf16.msra.mxu0 %v3618_v25  ;;  %1895 = vmatprep.subr.bf16.mxu1 %v3623_v46  ;;  %v3671_v44 = vld [vmem:[#allocation8 + $0x30c] ss:$16 sps:$4 sm:$0xff]   ;;  %v3666_v45 = vld [vmem:[#allocation8 + $0x168] ss:$16 sps:$4 sm:$0xff]  }
 0x191   :  { %1436 = vmatprep.subr.bf16.mxu0 %v3626_v48  ;;  %v914_v53 = vld [vmem:[#allocation3 + $0x20] sm:$0x33]  ;;  %v3669_v25 = vld [vmem:[#allocation8 + $0x308] ss:$16 sps:$4 sm:$0xff]   ;;  %v3674_v46 = vld [vmem:[#allocation8 + $0x18c] ss:$16 sps:$4 sm:$0xff]  }
 0x192   :  { %1879 = vmatmul.mubr.bf16.gmra.mrb[8].mxu1 %v4202_v37  ;;  %v4205_v54 = vcombine.high %v914_v53, %v914_v53  ;;  %v4207_v55 = vcombine.low %v914_v53, %v914_v53  ;;  %v3672_v48 = vld [vmem:[#allocation8 + $0x188] ss:$16 sps:$4 sm:$0xff]   ;;  %v3695_v63 = vld [vmem:[#allocation8 + $0x38c] ss:$16 sps:$4 sm:$0xff]  }
 0x193   :  { %1896 = vmatpush1.bf16.msra.mxu1 %v3621_v8  ;;  %1919 = vmatprep.mubr.bf16.mxu1 %v4153_v3  ;;  %v3675_v8 = vld [vmem:[#allocation8 + $0x328] ss:$16 sps:$4 sm:$0xff]  }
 0x194   :  { %1437 = vmatpush1.bf16.msra.mxu0 %v3624_v49  ;;  %1897 = vmatprep.subr.bf16.mxu1 %v3630_v50  ;;  %v1037_v59 = vshll.u32 %v4205_v54, 16  ;;  %v1029_v61 = vshll.u32 %v4207_v55, 16  ;;  %v1044_v3 = vshrl.u32 %v4205_v54, 16  ;;  %v1041_v0 = vshrl.u32 %v4207_v55, 16  ;;  %v3680_v49 = vld [vmem:[#allocation8 + $0x1ac] ss:$16 sps:$4 sm:$0xff]  }
 0x195   :  { %1438 = vmatprep.subr.bf16.mxu0 %v3633_v52  ;;  %v3683_v50 = vld [vmem:[#allocation8 + $0x34c] ss:$16 sps:$4 sm:$0xff]   ;;  %v3678_v52 = vld [vmem:[#allocation8 + $0x1a8] ss:$16 sps:$4 sm:$0xff]  }
 0x196   :  { %v1039_v2 = vrot.slane %v1037_v59, 1  ;;  %v1031_v4 = vrot.slane %v1029_v61, 1  ;;  %v3681_v53 = vld [vmem:[#allocation8 + $0x348] ss:$16 sps:$4 sm:$0xff]  }
 0x197   :  { %1898 = vmatpush1.bf16.msra.mxu1 %v3628_v56  ;;  %v3686_v56 = vld [vmem:[#allocation8 + $0x1cc] ss:$16 sps:$4 sm:$0xff]   ;;  %v3684_v58 = vld [vmem:[#allocation8 + $0x1c8] ss:$16 sps:$4 sm:$0xff]  }
 0x198   :  { %1439 = vmatpush1.bf16.msra.mxu0 %v3631_v57  ;;  %v4216_v6 = vsel %vm201_vm2, %v1035_v62, %v1039_v2  ;;  %1899 = vmatprep.subr.bf16.mxu1 %v3637_v60  ;;  %v4219_v10 = vsel %vm201_vm2, %v1027_v9, %v1031_v4  ;;  %v4221_v11 = vor.u32 %v1044_v3, %v1039_v2  ;;  %v3689_v57 = vld [vmem:[#allocation8 + $0x36c] ss:$16 sps:$4 sm:$0xff]   ;;  %v3687_v59 = vld [vmem:[#allocation8 + $0x368] ss:$16 sps:$4 sm:$0xff]   ;;  %v3696_v9 = vld [vmem:[#allocation8 + $0x400] ss:$16 sps:$4 sm:$0xff]  }
 0x199   :  { %1415 = vmatprep.mubr.bf16.mxu0 %v4216_v6  ;;  %1440 = vmatprep.subr.bf16.mxu0 %v3641_v1  ;;  %v4227_v22 = vor.u32 %v1041_v0, %v1031_v4  ;;  %v3692_v60 = vld [vmem:[#allocation8 + $0x1ec] ss:$16 sps:$4 sm:$0xff]   ;;  %v3690_v61 = vld [vmem:[#allocation8 + $0x1e8] ss:$16 sps:$4 sm:$0xff]   ;;  %v3698_v1 = vld [vmem:[#allocation8 + $0x404] ss:$16 sps:$4 sm:$0xff]  }
 0x19a   :  { %1416 = vmatmul.mubr.bf16.gmra.mrb[24].mxu0 %v4219_v10  ;;  %v3693_v62 = vld [vmem:[#allocation8 + $0x388] ss:$16 sps:$4 sm:$0xff]   ;;  %v3701_v2 = vld [vmem:[#allocation8 + $0x3ac] ss:$16 sps:$4 sm:$0xff]   ;;  %v3704_v3 = vld [vmem:[#allocation8 + $0x424] ss:$16 sps:$4 sm:$0xff]  }
 0x19b   :  { %1900 = vmatpush1.bf16.msra.mxu1 %v3635_v51  ;;  %1425 = vmatprep.mubr.bf16.mxu0 %v4221_v11  ;;  %v3699_v4 = vld [vmem:[#allocation8 + $0x3a8] ss:$16 sps:$4 sm:$0xff]   ;;  %v3707_v51 = vld [vmem:[#allocation8 + $0x3cc] ss:$16 sps:$4 sm:$0xff]   ;;  %v3719_v0 = vld [vmem:[#allocation8 + $0x484] ss:$16 sps:$4 sm:$0xff]  }
 0x19c   :  { %1441 = vmatpush1.bf16.msra.mxu0 %v3639_v29  ;;  %1901 = vmatprep.subr.bf16.mxu1 %v3644_v12  ;;  %v3702_v29 = vld [vmem:[#allocation8 + $0x420] ss:$16 sps:$4 sm:$0xff]   ;;  %v3705_v12 = vld [vmem:[#allocation8 + $0x3c8] ss:$16 sps:$4 sm:$0xff]   ;;  %vm4473_vm2 = vcmp.lt.s32.totalorder %v699_v27, 512 }
 0x19d   :  { %1442 = vmatprep.subr.bf16.mxu0 %v3647_v14  ;;  %v3710_v14 = vld [vmem:[#allocation8 + $0x444] ss:$16 sps:$4 sm:$0xff]  }
 0x19f   :  { %1902 = vmatpush1.bf16.msra.mxu1 %v3642_v15  ;;  %v3713_v15 = vld [vmem:[#allocation8 + $0x3ec] ss:$16 sps:$4 sm:$0xff]  }
 0x1a0   :  { %1443 = vmatpush1.bf16.msra.mxu0 %v3645_v16  ;;  %1903 = vmatprep.subr.bf16.mxu1 %v3650_v38  ;;  %v3708_v16 = vld [vmem:[#allocation8 + $0x440] ss:$16 sps:$4 sm:$0xff]   ;;  %v3711_v38 = vld [vmem:[#allocation8 + $0x3e8] ss:$16 sps:$4 sm:$0xff]  }
 0x1a1   :  { %1444 = vmatprep.subr.bf16.mxu0 %v3653_v20  ;;  %v3716_v20 = vld [vmem:[#allocation8 + $0x464] ss:$16 sps:$4 sm:$0xff]  }
 0x1a2   :  { %1426 = vmatmul.mubr.bf16.gmra.mrb[28].mxu0 %v4227_v22 }
 0x1a3   :  { %1904 = vmatpush1.bf16.msra.mxu1 %v3648_v21  ;;  %1466 = vmatprep.mubr.bf16.mxu0 %v4195_v28  ;;  %v3677_v28 = vld [vmem:[#allocation8 + $0x32c] ss:$16 sps:$4 sm:$0xff]   ;;  %v3717_v21 = vld [vmem:[#allocation8 + $0x480] ss:$16 sps:$4 sm:$0xff]  }
 0x1a4   :  { %1445 = vmatpush1.bf16.msra.mxu0 %v3651_v23  ;;  %1905 = vmatprep.subr.bf16.mxu1 %v3656_v7  ;;  %v3722_v23 = vld [vmem:[#allocation8 + $0x4a4] ss:$16 sps:$4 sm:$0xff]   ;;  %v3720_v7 = vld [vmem:[#allocation8 + $0x4a0] ss:$16 sps:$4 sm:$0xff]  }
 0x1a5   :  { %1446 = vmatprep.subr.bf16.mxu0 %v3659_v24  ;;  %v3723_v24 = vld [vmem:[#allocation8 + $0x4c0] ss:$16 sps:$4 sm:$0xff]  }
 0x1a7   :  { %1906 = vmatpush1.bf16.msra.mxu1 %v3654_v26  ;;  %v3731_v26 = vld [vmem:[#allocation8 + $0x504] ss:$16 sps:$4 sm:$0xff]  }
 0x1a8   :  { %1447 = vmatpush1.bf16.msra.mxu0 %v3657_v31  ;;  %1907 = vmatprep.subr.bf16.mxu1 %v3662_v34  ;;  %v3734_v31 = vld [vmem:[#allocation8 + $0x524] ss:$16 sps:$4 sm:$0xff]   ;;  %v3732_v34 = vld [vmem:[#allocation8 + $0x520] ss:$16 sps:$4 sm:$0xff]  }
 0x1a9   :  { %1448 = vmatprep.subr.bf16.mxu0 %v3665_v39  ;;  %v3735_v39 = vld [vmem:[#allocation8 + $0x540] ss:$16 sps:$4 sm:$0xff]  }
 0x1ab   :  { %1908 = vmatpush1.bf16.msra.mxu1 %v3660_v41  ;;  %v3738_v41 = vld [vmem:[#allocation8 + $0x560] ss:$16 sps:$4 sm:$0xff]  }
 0x1ac   :  { %1449 = vmatpush1.bf16.msra.mxu0 %v3663_v42  ;;  %1909 = vmatprep.subr.bf16.mxu1 %v3668_v43  ;;  %v3743_v42 = vld [vmem:[#allocation8 + $0x584] ss:$16 sps:$4 sm:$0xff]   ;;  %v3741_v43 = vld [vmem:[#allocation8 + $0x580] ss:$16 sps:$4 sm:$0xff]  }
 0x1ad   :  { %1450 = vmatprep.subr.bf16.mxu0 %v3671_v44  ;;  %v3744_v44 = vld [vmem:[#allocation8 + $0x5a0] ss:$16 sps:$4 sm:$0xff]  }
 0x1af   :  { %1910 = vmatpush1.bf16.msra.mxu1 %v3666_v45  ;;  %v3749_v45 = vld [vmem:[#allocation8 + $0x5c4] ss:$16 sps:$4 sm:$0xff]  }
 0x1b0   :  { %1451 = vmatpush1.bf16.msra.mxu0 %v3669_v25  ;;  %1911 = vmatprep.subr.bf16.mxu1 %v3674_v46  ;;  %v3747_v25 = vld [vmem:[#allocation8 + $0x5c0] ss:$16 sps:$4 sm:$0xff]   ;;  %v3752_v46 = vld [vmem:[#allocation8 + $0x5e4] ss:$16 sps:$4 sm:$0xff]  }
 0x1b1   :  { %1452 = vmatprep.subr.bf16.mxu0 %v3677_v28  ;;  %v3168_v28 = vcombine.low %v4167_v13, %v4104_v19  ;;  %v3756_v13 = vld [vmem:[#allocation8 + $0x428] ss:$16 sps:$4 sm:$0xff]  }
 0x1b3   :  { %1912 = vmatpush1.bf16.msra.mxu1 %v3672_v48  ;;  %v3750_v48 = vld [vmem:[#allocation8 + $0x5e0] ss:$16 sps:$4 sm:$0xff]  }
 0x1b4   :  { %1453 = vmatpush1.bf16.msra.mxu0 %v3675_v8  ;;  %1913 = vmatprep.subr.bf16.mxu1 %v3680_v49  ;;  %v3755_v8 = vld [vmem:[#allocation8 + $0x40c] ss:$16 sps:$4 sm:$0xff]   ;;  %v2020_v49 = vrot.slane %v4177_v18, 1 }
 0x1b5   :  { %1454 = vmatprep.subr.bf16.mxu0 %v3683_v50  ;;  %v4246_v50 = vrot.slane %v4205_v54, 1  ;;  %v4260_v54 = vrot.slane %v4207_v55, 1  ;;  %v3768_v55 = vld [vmem:[#allocation8 + $0x4a8] ss:$16 sps:$4 sm:$0xff]  }
 0x1b7   :  { %1914 = vmatpush1.bf16.msra.mxu1 %v3678_v52  ;;  %v2019_v52 = vrot.slane %v3168_v28, 1  ;;  %v4256_v19 = vsel %vm537_vm6, %v2023_v40, %v4246_v50  ;;  %v3767_v40 = vld [vmem:[#allocation8 + $0x48c] ss:$16 sps:$4 sm:$0xff]  }
 0x1b8   :  { %1455 = vmatpush1.bf16.msra.mxu0 %v3681_v53  ;;  %1915 = vmatprep.subr.bf16.mxu1 %v3686_v56  ;;  %v3753_v53 = vld [vmem:[#allocation8 + $0x408] ss:$16 sps:$4 sm:$0xff]   ;;  %v3758_v56 = vld [vmem:[#allocation8 + $0x42c] ss:$16 sps:$4 sm:$0xff]  }
 0x1b9   :  { %1456 = vmatprep.subr.bf16.mxu0 %v3689_v57  ;;  %v4249_v57 = vsel %vm537_vm6, %v2019_v52, %v2020_v49 }
 0x1bb   :  { %1916 = vmatpush1.bf16.msra.mxu1 %v3684_v58  ;;  %v3759_v58 = vld [vmem:[#allocation8 + $0x448] ss:$16 sps:$4 sm:$0xff]  }
 0x1bc   :  { %1457 = vmatpush1.bf16.msra.mxu0 %v3687_v59  ;;  %1917 = vmatprep.subr.bf16.mxu1 %v3692_v60  ;;  %v3764_v59 = vld [vmem:[#allocation8 + $0x46c] ss:$16 sps:$4 sm:$0xff]   ;;  %v2026_v60 = vsel %vm537_vm6, %v2020_v49, %v4260_v54 }
 0x1bd   :  { %1458 = vmatprep.subr.bf16.mxu0 %v3695_v63  ;;  %v3765_v63 = vld [vmem:[#allocation8 + $0x488] ss:$16 sps:$4 sm:$0xff]  }
 0x1bf   :  { %1918 = vmatpush1.bf16.msra.mxu1 %v3690_v61  ;;  %v3770_v61 = vld [vmem:[#allocation8 + $0x4ac] ss:$16 sps:$4 sm:$0xff]  }
 0x1c0   :  { %1459 = vmatpush1.bf16.msra.mxu0 %v3693_v62  ;;  %2355 = vmatprep.subr.bf16.mxu1 %v3698_v1  ;;  %v3773_v62 = vld [vmem:[#allocation8 + $0x4cc] ss:$16 sps:$4 sm:$0xff]   ;;  %v3771_v1 = vld [vmem:[#allocation8 + $0x4c8] ss:$16 sps:$4 sm:$0xff]  }
 0x1c1   :  { %1460 = vmatprep.subr.bf16.mxu0 %v3701_v2  ;;  %v3776_v2 = vld [vmem:[#allocation8 + $0x4ec] ss:$16 sps:$4 sm:$0xff]  }
 0x1c2   :  { %1920 = vmatmul.mubr.bf16.vlgmr.msra.gmra.mrb[12].mxu1 %v4156_v5  ;;  %v3714_v5 = vld [vmem:[#allocation8 + $0x460] ss:$16 sps:$4 sm:$0xff]  }
 0x1c3   :  { %1929 = vmatprep.mubr.bf16.mxu1 %v4175_v17  ;;  %2356 = vmatpush1.bf16.msra.mxu1 %v3696_v9  ;;  %v3762_v17 = vld [vmem:[#allocation8 + $0x468] ss:$16 sps:$4 sm:$0xff]  }
 0x1c4   :  { %1461 = vmatpush1.bf16.msra.mxu0 %v3699_v4  ;;  %2357 = vmatprep.subr.bf16.mxu1 %v3704_v3  ;;  %v3774_v9 = vld [vmem:[#allocation8 + $0x4e8] ss:$16 sps:$4 sm:$0xff]   ;;  %v3779_v4 = vld [vmem:[#allocation8 + $0x50c] ss:$16 sps:$4 sm:$0xff]  }
 0x1c5   :  { %1462 = vmatprep.subr.bf16.mxu0 %v3707_v51  ;;  %v3777_v3 = vld [vmem:[#allocation8 + $0x508] ss:$16 sps:$4 sm:$0xff]   ;;  %v3782_v51 = vld [vmem:[#allocation8 + $0x52c] ss:$16 sps:$4 sm:$0xff]  }
 0x1c7   :  { %2358 = vmatpush1.bf16.msra.mxu1 %v3702_v29  ;;  %v3780_v29 = vld [vmem:[#allocation8 + $0x528] ss:$16 sps:$4 sm:$0xff]  }
 0x1c8   :  { %1463 = vmatpush1.bf16.msra.mxu0 %v3705_v12  ;;  %2359 = vmatprep.subr.bf16.mxu1 %v3710_v14  ;;  %v3785_v12 = vld [vmem:[#allocation8 + $0x54c] ss:$16 sps:$4 sm:$0xff]  }
 0x1c9   :  { %1464 = vmatprep.subr.bf16.mxu0 %v3713_v15  ;;  %v3788_v14 = vld [vmem:[#allocation8 + $0x56c] ss:$16 sps:$4 sm:$0xff]   ;;  %v3786_v15 = vld [vmem:[#allocation8 + $0x568] ss:$16 sps:$4 sm:$0xff]  }
 0x1ca   :  { %1930 = vmatmul.mubr.bf16.gmra.mrb[16].mxu1 %v4177_v18  ;;  %v3761_v18 = vld [vmem:[#allocation8 + $0x44c] ss:$16 sps:$4 sm:$0xff]  }
 0x1cb   :  { %1939 = vmatprep.mubr.bf16.mxu1 %v4182_v30  ;;  %2360 = vmatpush1.bf16.msra.mxu1 %v3708_v16  ;;  %v3725_v30 = vld [vmem:[#allocation8 + $0x4c4] ss:$16 sps:$4 sm:$0xff]   ;;  %v3791_v16 = vld [vmem:[#allocation8 + $0x58c] ss:$16 sps:$4 sm:$0xff]  }
 0x1cc   :  { %1465 = vmatpush1.bf16.msra.mxu0 %v3711_v38  ;;  %2361 = vmatprep.subr.bf16.mxu1 %v3716_v20  ;;  %v3789_v38 = vld [vmem:[#allocation8 + $0x588] ss:$16 sps:$4 sm:$0xff]   ;;  %v3794_v20 = vld [vmem:[#allocation8 + $0x5ac] ss:$16 sps:$4 sm:$0xff]  }
 0x1cf   :  { %1467 = vmatmul.mubr.bf16.vlgmr.msra.gmra.mrb[32].mxu0 %v4198_v36  ;;  %2362 = vmatpush1.bf16.msra.mxu1 %v3714_v5  ;;  %v3728_v36 = vld [vmem:[#allocation8 + $0x4e4] ss:$16 sps:$4 sm:$0xff]   ;;  %v3792_v5 = vld [vmem:[#allocation8 + $0x5a8] ss:$16 sps:$4 sm:$0xff]  }
 0x1d0   :  { %1476 = vmatprep.mubr.bf16.mxu0 %v4216_v6  ;;  %2363 = vmatprep.subr.bf16.mxu1 %v3719_v0  ;;  %v3726_v6 = vld [vmem:[#allocation8 + $0x4e0] ss:$16 sps:$4 sm:$0xff]   ;;  %v3797_v0 = vld [vmem:[#allocation8 + $0x5cc] ss:$16 sps:$4 sm:$0xff]  }
 0x1d2   :  { %1940 = vmatmul.mubr.bf16.gmra.mrb[20].mxu1 %v4202_v37  ;;  %v3729_v37 = vld [vmem:[#allocation8 + $0x500] ss:$16 sps:$4 sm:$0xff]  }
 0x1d3   :  { %2364 = vmatpush1.bf16.msra.mxu1 %v3717_v21  ;;  %2387 = vmatprep.mubr.bf16.mxu1 %v4192_v47  ;;  %v3795_v21 = vld [vmem:[#allocation8 + $0x5c8] ss:$16 sps:$4 sm:$0xff]  }
 0x1d4   :  { %2365 = vmatprep.subr.bf16.mxu1 %v3722_v23  ;;  %v3800_v23 = vld [vmem:[#allocation8 + $0x5ec] ss:$16 sps:$4 sm:$0xff]  }
 0x1d7   :  { %1477 = vmatmul.mubr.bf16.gmra.mrb[36].mxu0 %v4219_v10  ;;  %2366 = vmatpush1.bf16.msra.mxu1 %v3720_v7  ;;  %v3737_v10 = vld [vmem:[#allocation8 + $0x544] ss:$16 sps:$4 sm:$0xff]   ;;  %v3798_v7 = vld [vmem:[#allocation8 + $0x5e8] ss:$16 sps:$4 sm:$0xff]  }
 0x1d8   :  { %1486 = vmatprep.mubr.bf16.mxu0 %v4221_v11  ;;  %2367 = vmatprep.subr.bf16.mxu1 %v3725_v30  ;;  %v3740_v11 = vld [vmem:[#allocation8 + $0x564] ss:$16 sps:$4 sm:$0xff]  }
 0x1db   :  { %2368 = vmatpush1.bf16.msra.mxu1 %v3723_v24 }
 0x1dc   :  { %2369 = vmatprep.subr.bf16.mxu1 %v3728_v36 }
 0x1df   :  { %1487 = vmatmul.mubr.bf16.gmra.mrb[40].mxu0 %v4227_v22  ;;  %2370 = vmatpush1.bf16.msra.mxu1 %v3726_v6  ;;  %v3746_v22 = vld [vmem:[#allocation8 + $0x5a4] ss:$16 sps:$4 sm:$0xff]  }
 0x1e0   :  { %2371 = vmatprep.subr.bf16.mxu1 %v3731_v26 }
 0x1e3   :  { %2372 = vmatpush1.bf16.msra.mxu1 %v3729_v37 }
 0x1e4   :  { %2373 = vmatprep.subr.bf16.mxu1 %v3734_v31 }
 0x1e7   :  { %2374 = vmatpush1.bf16.msra.mxu1 %v3732_v34 }
 0x1e8   :  { %2375 = vmatprep.subr.bf16.mxu1 %v3737_v10 }
 0x1eb   :  { %2376 = vmatpush1.bf16.msra.mxu1 %v3735_v39 }
 0x1ec   :  { %2377 = vmatprep.subr.bf16.mxu1 %v3740_v11 }
 0x1ef   :  { %2378 = vmatpush1.bf16.msra.mxu1 %v3738_v41 }
 0x1f0   :  { %2379 = vmatprep.subr.bf16.mxu1 %v3743_v42 }
 0x1f3   :  { %2380 = vmatpush1.bf16.msra.mxu1 %v3741_v43 }
 0x1f4   :  { %2381 = vmatprep.subr.bf16.mxu1 %v3746_v22 }
 0x1f7   :  { %2382 = vmatpush1.bf16.msra.mxu1 %v3744_v44 }
 0x1f8   :  { %2383 = vmatprep.subr.bf16.mxu1 %v3749_v45 }
 0x1fb   :  { %2384 = vmatpush1.bf16.msra.mxu1 %v3747_v25 }
 0x1fc   :  { %2385 = vmatprep.subr.bf16.mxu1 %v3752_v46 }
 0x1ff   :  { %2386 = vmatpush1.bf16.msra.mxu1 %v3750_v48 }
 0x200   :  { %2416 = vmatprep.subr.bf16.mxu1 %v3755_v8 }
 0x202   :  { %2388 = vmatmul.mubr.bf16.vlgmr.msra.gmra.mrb[0].mxu1 %v4249_v57 }
 0x203   :  { %2397 = vmatprep.mubr.bf16.mxu1 %v4256_v19  ;;  %2417 = vmatpush1.bf16.msra.mxu1 %v3753_v53 }
 0x204   :  { %2418 = vmatprep.subr.bf16.mxu1 %v3758_v56 }
 0x207   :  { %2419 = vmatpush1.bf16.msra.mxu1 %v3756_v13 }
 0x208   :  { %2420 = vmatprep.subr.bf16.mxu1 %v3761_v18  ;;  %v2738_v18 = vld [vmem:[%s4595_s5 + $0x80] sm:$0xff] }
 0x20a   :  { %2398 = vmatmul.mubr.bf16.gmra.mrb[4].mxu1 %v2026_v60 }
 0x20b   :  { %2407 = vmatprep.mubr.bf16.mxu1 %v4246_v50  ;;  %2421 = vmatpush1.bf16.msra.mxu1 %v3759_v58 }
 0x20c   :  { %2422 = vmatprep.subr.bf16.mxu1 %v3764_v59 }
 0x20f   :  { %2423 = vmatpush1.bf16.msra.mxu1 %v3762_v17  ;;  %v2723_v17 = vld [vmem:[%s4595_s5 + $0x8] sm:$0xff] }
 0x210   :  { %2424 = vmatprep.subr.bf16.mxu1 %v3767_v40 }
 0x212   :  { %2408 = vmatmul.mubr.bf16.gmra.mrb[24].mxu1 %v4260_v54 }
 0x213   :  { %2425 = vmatpush1.bf16.msra.mxu1 %v3765_v63  ;;  %2448 = vmatprep.mubr.bf16.mxu1 %v4192_v47  ;;  %v3783_v47 = vld [vmem:[#allocation8 + $0x548] ss:$16 sps:$4 sm:$0xff]  }
 0x214   :  { %2426 = vmatprep.subr.bf16.mxu1 %v3770_v61 }
 0x217   :  { %2427 = vmatpush1.bf16.msra.mxu1 %v3768_v55 }
 0x218   :  { %2428 = vmatprep.subr.bf16.mxu1 %v3773_v62 }
 0x21b   :  { %2429 = vmatpush1.bf16.msra.mxu1 %v3771_v1 }
 0x21c   :  { %2430 = vmatprep.subr.bf16.mxu1 %v3776_v2  ;;  %v2740_v2 = vld [vmem:[%s4595_s5 + $0x90] sm:$0xff] }
 0x21f   :  { %2431 = vmatpush1.bf16.msra.mxu1 %v3774_v9  ;;  %v2741_v9 = vld [vmem:[%s4595_s5 + $0x98] sm:$0xff] }
 0x220   :  { %2432 = vmatprep.subr.bf16.mxu1 %v3779_v4  ;;  %v3314_v4 = vpack.c.bf16 %v2741_v9, %v2740_v2  ;;  %v2737_v2 = vld [vmem:[%s4595_s5 + $0x78] sm:$0xff] }
 0x223   :  { %2433 = vmatpush1.bf16.msra.mxu1 %v3777_v3  ;;  %v2724_v3 = vld [vmem:[%s4595_s5 + $0x10] sm:$0xff] }
 0x224   :  { %2434 = vmatprep.subr.bf16.mxu1 %v3782_v51  ;;  %v2725_v51 = vld [vmem:[%s4595_s5 + $0x18] sm:$0xff] }
 0x227   :  { %2435 = vmatpush1.bf16.msra.mxu1 %v3780_v29  ;;  %v3316_v29 = vpack.c.bf16 %v2725_v51, %v2724_v3  ;;  %v2770_v3 = vld [vmem:[%s4595_s5 + $0x180] sm:$0xff]  ;;  %v2771_v51 = vld [vmem:[%s4595_s5 + $0x188] sm:$0xff] }
 0x228   :  { %2436 = vmatprep.subr.bf16.mxu1 %v3785_v12  ;;  %v2742_v12 = vld [vmem:[%s4595_s5 + $0xa0] sm:$0xff] }
 0x22b   :  { %2437 = vmatpush1.bf16.msra.mxu1 %v3783_v47  ;;  %v2743_v47 = vld [vmem:[%s4595_s5 + $0xa8] sm:$0xff] }
 0x22c   :  { %2438 = vmatprep.subr.bf16.mxu1 %v3788_v14  ;;  %v3318_v14 = vpack.c.bf16 %v2743_v47, %v2742_v12 }
 0x22f   :  { %2439 = vmatpush1.bf16.msra.mxu1 %v3786_v15  ;;  %v2726_v15 = vld [vmem:[%s4595_s5 + $0x20] sm:$0xff] }
 0x230   :  { %2440 = vmatprep.subr.bf16.mxu1 %v3791_v16  ;;  %v2727_v16 = vld [vmem:[%s4595_s5 + $0x28] sm:$0xff] }
 0x233   :  { %2441 = vmatpush1.bf16.msra.mxu1 %v3789_v38  ;;  %v3320_v38 = vpack.c.bf16 %v2727_v16, %v2726_v15 }
 0x234   :  { %2442 = vmatprep.subr.bf16.mxu1 %v3794_v20  ;;  %v2744_v20 = vld [vmem:[%s4595_s5 + $0xb0] sm:$0xff] }
 0x237   :  { %2443 = vmatpush1.bf16.msra.mxu1 %v3792_v5  ;;  %v2745_v5 = vld [vmem:[%s4595_s5 + $0xb8] sm:$0xff] }
 0x238   :  { %2444 = vmatprep.subr.bf16.mxu1 %v3797_v0  ;;  %v3322_v0 = vpack.c.bf16 %v2745_v5, %v2744_v20 }
 0x23b   :  { %2445 = vmatpush1.bf16.msra.mxu1 %v3795_v21  ;;  %v2728_v21 = vld [vmem:[%s4595_s5 + $0x30] sm:$0xff] }
 0x23c   :  { %2446 = vmatprep.subr.bf16.mxu1 %v3800_v23  ;;  %v2729_v23 = vld [vmem:[%s4595_s5 + $0x38] sm:$0xff] }
 0x23f   :  { %2447 = vmatpush1.bf16.msra.mxu1 %v3798_v7  ;;  %v3324_v7 = vpack.c.bf16 %v2729_v23, %v2728_v21 }
 0x242   :  { %2449 = vmatmul.mubr.bf16.vlgmr.msra.gmra.mrb[12].mxu1 %v4249_v57 }
 0x243   :  { %2458 = vmatprep.mubr.bf16.mxu1 %v4256_v19 }
 0x24a   :  { %2459 = vmatmul.mubr.bf16.gmra.mrb[16].mxu1 %v2026_v60  ;;  %v2722_v60 = vld [vmem:[%s4595_s5] sm:$0xff] }
 0x24b   :  { %2468 = vmatprep.mubr.bf16.mxu1 %v4246_v50  ;;  %v3312_v61 = vpack.c.bf16 %v2723_v17, %v2722_v60  ;;  %v2752_v17 = vld [vmem:[%s4595_s5 + $0xf0] sm:$0xff] }
 0x252   :  { %2469 = vmatmul.mubr.bf16.gmra.mrb[28].mxu1 %v4260_v54  ;;  %v2739_v54 = vld [vmem:[%s4595_s5 + $0x88] sm:$0xff] }
 0x253   :  { %v3310_v59 = vpack.c.bf16 %v2739_v54, %v2738_v18  ;;  %v2751_v54 = vld [vmem:[%s4595_s5 + $0xe8] sm:$0xff] }
 0x255   :  { %3311 = vmatprep.subr.bf16.mxu0 %v3310_v59  ;;  %v2735_v59 = vld [vmem:[%s4595_s5 + $0x68] sm:$0xff] }
 0x256   :  { %3313 = vmatpush3.bf16.msra.mxu0 %v3312_v61 }
 0x257   :  { %3315 = vmatprep.subr.bf16.mxu0 %v3314_v4  ;;  %v4410_v4 = vld [vmem:[%s4594_s4] sm:$0xf] }
 0x258   :  { %v2502_v12 = vrot.slane %v4410_v4, %v701_v33 }
 0x25a   :  { %3317 = vmatpush3.bf16.msra.mxu0 %v3316_v29  ;;  %v3342_v29 = vpack.c.bf16 %v2771_v51, %v2770_v3 }
 0x25b   :  { %3319 = vmatprep.subr.bf16.mxu0 %v3318_v14  ;;  %v2506_v14 = vrot.slane %v4410_v4, %v705_v35 }
 0x25e   :  { %3321 = vmatpush3.bf16.msra.mxu0 %v3320_v38 }
 0x25f   :  { %3323 = vmatprep.subr.bf16.mxu0 %v3322_v0 }
 0x262   :  { %v4271_v30 = vpop.f32.mrb[20].mxu0  ;;  %3325 = vmatpush3.bf16.msra.mxu0 %v3324_v7 }
 0x263   :  { %v4273_v24 = vpop.f32.mrb[21].mxu0 }
 0x264   :  { %v4275_v36 = vpop.f32.mrb[22].mxu0 }
 0x265   :  { %v4277_v6 = vpop.f32.mrb[23].mxu0  ;;  %v1880_v26 = vpop.f32.mrb[8].mxu1 }
 0x266   :  { %v1882_v37 = vpop.f32.mrb[9].mxu1 }
 0x267   :  { %v1884_v31 = vpop.f32.mrb[10].mxu1 }
 0x268   :  { %v1885_v34 = vpop.f32.mrb[11].mxu1 }
 0x269   :  { %v2730_v34 = vld [vmem:[%s4595_s5 + $0x40] sm:$0xff] }
 0x26d   :  { %v4279_v10 = vpop.f32.mrb[24].mxu0 }
 0x26e   :  { %v4281_v39 = vpop.f32.mrb[25].mxu0 }
 0x26f   :  { %v4283_v11 = vpop.f32.mrb[26].mxu0 }
 0x270   :  { %v4285_v41 = vpop.f32.mrb[27].mxu0 }
 0x275   :  { %v1427_v42 = vpop.f32.mrb[28].mxu0 }
 0x276   :  { %v4287_v43 = vadd.f32 %v1880_v26, %v1427_v42  ;;  %v1429_v22 = vpop.f32.mrb[29].mxu0  ;;  %v2746_v26 = vld [vmem:[%s4595_s5 + $0xc0] sm:$0xff]  ;;  %v2731_v42 = vld [vmem:[%s4595_s5 + $0x48] sm:$0xff] }
 0x277   :  { %v4289_v44 = vadd.f32 %v1882_v37, %v1429_v22  ;;  %v1431_v45 = vpop.f32.mrb[30].mxu0  ;;  %v2747_v37 = vld [vmem:[%s4595_s5 + $0xc8] sm:$0xff]  ;;  %v3328_v22 = vpack.c.bf16 %v2731_v42, %v2730_v34 }
 0x278   :  { %v1432_v25 = vpop.f32.mrb[31].mxu0  ;;  %v3326_v31 = vpack.c.bf16 %v2747_v37, %v2746_v26  ;;  %v2748_v45 = vld [vmem:[%s4595_s5 + $0xd0] sm:$0xff] }
 0x279   :  { %v2749_v25 = vld [vmem:[%s4595_s5 + $0xd8] sm:$0xff] }
 0x27a   :  { %3327 = vmatprep.subr.bf16.mxu0 %v3326_v31 }
 0x27b   :  { %3329 = vmatpush3.bf16.msra.mxu0 %v3328_v22 }
 0x2a2   :  { %v4291_v46 = vpop.f32.mrb[32].mxu0 }
 0x2a3   :  { %v4293_v28 = vpop.f32.mrb[33].mxu0 }
 0x2a4   :  { %v4295_v48 = vpop.f32.mrb[34].mxu0 }
 0x2a5   :  { %v4297_v8 = vpop.f32.mrb[35].mxu0  ;;  %v1941_v49 = vpop.f32.mrb[20].mxu1 }
 0x2a6   :  { %v1943_v50 = vpop.f32.mrb[21].mxu1 }
 0x2a7   :  { %v1945_v52 = vpop.f32.mrb[22].mxu1 }
 0x2a8   :  { %v1946_v53 = vpop.f32.mrb[23].mxu1  ;;  %v2733_v52 = vld [vmem:[%s4595_s5 + $0x58] sm:$0xff] }
 0x2a9   :  { %v2750_v53 = vld [vmem:[%s4595_s5 + $0xe0] sm:$0xff] }
 0x2aa   :  { %v4299_v56 = vpop.f32.mrb[36].mxu0  ;;  %v3334_v60 = vpack.c.bf16 %v2751_v54, %v2750_v53 }
 0x2ab   :  { %v4301_v57 = vpop.f32.mrb[37].mxu0 }
 0x2ac   :  { %v4303_v19 = vpop.f32.mrb[38].mxu0 }
 0x2ad   :  { %v4305_v13 = vpop.f32.mrb[39].mxu0 }
 0x2b2   :  { %v1488_v58 = vpop.f32.mrb[40].mxu0 }
 0x2b3   :  { %v4319_v40 = vadd.f32 %v1941_v49, %v1488_v58  ;;  %v1490_v63 = vpop.f32.mrb[41].mxu0  ;;  %v3330_v49 = vpack.c.bf16 %v2749_v25, %v2748_v45  ;;  %v2734_v58 = vld [vmem:[%s4595_s5 + $0x60] sm:$0xff] }
 0x2b4   :  { %v4321_v55 = vadd.f32 %v1943_v50, %v1490_v63  ;;  %v1492_v62 = vpop.f32.mrb[42].mxu0  ;;  %v2732_v50 = vld [vmem:[%s4595_s5 + $0x50] sm:$0xff]  ;;  %v2753_v63 = vld [vmem:[%s4595_s5 + $0xf8] sm:$0xff]  ;;  %v3336_v61 = vpack.c.bf16 %v2735_v59, %v2734_v58 }
 0x2b5   :  { %v1493_v1 = vpop.f32.mrb[43].mxu0  ;;  %v3332_v18 = vpack.c.bf16 %v2733_v52, %v2732_v50  ;;  %3331 = vmatprep.subr.bf16.mxu0 %v3330_v49  ;;  %v3338_v62 = vpack.c.bf16 %v2753_v63, %v2752_v17 }
 0x2b6   :  { %v2736_v1 = vld [vmem:[%s4595_s5 + $0x70] sm:$0xff] }
 0x2b7   :  { %3333 = vmatpush3.bf16.msra.mxu0 %v3332_v18  ;;  %v3340_v9 = vpack.c.bf16 %v2737_v2, %v2736_v1 }
 0x2b8   :  { %3335 = vmatprep.subr.bf16.mxu0 %v3334_v60 }
 0x2bb   :  { %3337 = vmatpush3.bf16.msra.mxu0 %v3336_v61 }
 0x2bc   :  { %3339 = vmatprep.subr.bf16.mxu0 %v3338_v62 }
 0x2bf   :  { %3341 = vmatpush3.bf16.msra.mxu0 %v3340_v9 }
 0x2c0   :  { %3343 = vmatprep.subr.bf16.mxu0 %v3342_v29 }
 0x2d5   :  { %v2389_v47 = vpop.f32.mrb[0].mxu1 }
 0x2d6   :  { %v3374_v15 = vadd.f32 %v2389_v47, %v4271_v30  ;;  %v2391_v16 = vpop.f32.mrb[1].mxu1 }
 0x2d7   :  { %v3375_v38 = vadd.f32 %v2391_v16, %v4273_v24  ;;  %v2393_v20 = vpop.f32.mrb[2].mxu1 }
 0x2d8   :  { %v2519_v5 = vadd.f32 %v3374_v15, %v2502_v12  ;;  %v3376_v0 = vadd.f32 %v2393_v20, %v4275_v36  ;;  %v2395_v21 = vpop.f32.mrb[3].mxu1 }
 0x2d9   :  { %v2520_v23 = vadd.f32 %v3375_v38, %v2506_v14  ;;  %v3377_v7 = vadd.f32 %v2395_v21, %v4277_v6 }
 0x2da   :  { %v2523_v33 = vadd.f32 %v3376_v0, %v2502_v12  ;;  %v2539_v37 = vmax.f32 %v2519_v5, 0.0 }
 0x2db   :  { %v2524_v26 = vadd.f32 %v3377_v7, %v2506_v14  ;;  %v2540_v34 = vmax.f32 %v2520_v23, 0.0 }
 0x2dc   :  { %v2543_v31 = vmax.f32 %v2523_v33, 0.0 }
 0x2dd   :  { %v2544_v42 = vmax.f32 %v2524_v26, 0.0  ;;  %v2399_v35 = vpop.f32.mrb[4].mxu1 }
 0x2de   :  { %v2559_v22 = vadd.f32 %v2543_v31, %v2539_v37  ;;  %v3378_v30 = vadd.f32 %v2399_v35, %v4279_v10  ;;  %v2401_v45 = vpop.f32.mrb[5].mxu1 }
 0x2df   :  { %v2566_v24 = vadd.f32 %v2544_v42, %v2540_v34  ;;  %v3379_v25 = vadd.f32 %v2401_v45, %v4281_v39  ;;  %v2403_v49 = vpop.f32.mrb[6].mxu1 }
 0x2e0   :  { %v2560_v36 = vrot.slane %v2559_v22, 4  ;;  %v2527_v50 = vadd.f32 %v3378_v30, %v2502_v12  ;;  %v3380_v52 = vadd.f32 %v2403_v49, %v4283_v11  ;;  %v2405_v6 = vpop.f32.mrb[7].mxu1 }
 0x2e1   :  { %v2567_v53 = vrot.slane %v2566_v24, 4  ;;  %v2528_v18 = vadd.f32 %v3379_v25, %v2506_v14  ;;  %v3381_v54 = vadd.f32 %v2405_v6, %v4285_v41 }
 0x2e2   :  { %v2561_v58 = vadd.f32 %v2560_v36, %v2559_v22  ;;  %v2547_v59 = vmax.f32 %v2527_v50, 0.0  ;;  %v2531_v60 = vadd.f32 %v3380_v52, %v2502_v12 }
 0x2e3   :  { %v2568_v17 = vadd.f32 %v2567_v53, %v2566_v24  ;;  %v2548_v63 = vmax.f32 %v2528_v18, 0.0  ;;  %v2532_v10 = vadd.f32 %v3381_v54, %v2506_v14 }
 0x2e4   :  { %v2562_v61 = vrot.slane %v2561_v58, 2  ;;  %v2551_v62 = vmax.f32 %v2531_v60, 0.0  ;;  %v2634_v3 = vrot.slane %v2547_v59, 2  ;;  %v2509_v59 = vsub.s32 2, %v4076_v32 }
 0x2e5   :  { %v2569_v1 = vrot.slane %v2568_v17, 2  ;;  %v2552_v39 = vmax.f32 %v2532_v10, 0.0  ;;  %v2409_v2 = vpop.f32.mrb[24].mxu1  ;;  %v2637_v41 = vrot.slane %v2548_v63, 2  ;;  %v2513_v60 = vsub.s32 3, %v4076_v32 }
 0x2e6   :  { %v2563_v9 = vadd.f32 %v2562_v61, %v2561_v58  ;;  %v2635_v11 = vrot.slane %v2551_v62, 2  ;;  %v2493_v51 = vadd.f32 %v2409_v2, %v4287_v43  ;;  %v2411_v29 = vpop.f32.mrb[25].mxu1 }
 0x2e7   :  { %v2570_v47 = vadd.f32 %v2569_v1, %v2568_v17  ;;  %v2638_v15 = vrot.slane %v2552_v39, 2  ;;  %v2494_v16 = vadd.f32 %v2411_v29, %v4289_v44  ;;  %v2413_v38 = vpop.f32.mrb[26].mxu1  ;;  %v2510_v17 = vrot.slane %v4410_v4, %v2509_v59 }
 0x2e8   :  { %v2564_v20 = vrot.slane %v2563_v9, 1  ;;  %v2636_v5 = vsel %vm2633_vm0, %v2634_v3, %v2635_v11  ;;  %v2535_v0 = vadd.f32 %v2502_v12, %v2493_v51  ;;  %v2414_v21 = vpop.f32.mrb[27].mxu1  ;;  %v2514_v10 = vrot.slane %v4410_v4, %v2513_v60 }
 0x2e9   :  { %v2571_v23 = vrot.slane %v2570_v47, 1  ;;  %v2639_v7 = vsel %vm2633_vm0, %v2637_v41, %v2638_v15  ;;  %v2536_v33 = vadd.f32 %v2506_v14, %v2494_v16 }
 0x2ea   :  { %v4436_v26 = vadd.f32 %v2564_v20, %v2563_v9  ;;  %v2555_v37 = vmax.f32 %v2535_v0, 0.0 }
 0x2eb   :  { %v4438_v43 = vadd.f32 %v2571_v23, %v2570_v47  ;;  %v2556_v31 = vmax.f32 %v2536_v33, 0.0  ;;  %v3881_v33 = vmov 1966171168  }
 0x2ec   :  { %v2646_v34 = vrot.slane %v2555_v37, 2  ;;  %v2594_v37 = vunpack.c.l.s4 %v3881_v33 }
 0x2ed   :  { %v2591_v44 = vcombine.low %v4436_v26, %v4438_v43  ;;  %v2648_v42 = vrot.slane %v2556_v31, 2 }
 0x2ee   :  { %v2647_v35 = vsel %vm2633_vm0, %v2635_v11, %v2646_v34 }
 0x2ef   :  { %v2662_v22 = vadd.f32 %v2647_v35, %v2636_v5  ;;  %v2649_v12 = vsel %vm2633_vm0, %v2638_v15, %v2648_v42 }
 0x2f0   :  { %v2669_v30 = vadd.f32 %v2649_v12, %v2639_v7 }
 0x2f1   :  { %v2663_v45 = vrot.slane %v2662_v22, 4 }
 0x2f2   :  { %v2670_v24 = vrot.slane %v2669_v30, 4 }
 0x2f3   :  { %v2664_v14 = vadd.f32 %v2663_v45, %v2662_v22 }
 0x2f4   :  { %v2671_v25 = vadd.f32 %v2670_v24, %v2669_v30 }
 0x2f5   :  { %v2665_v49 = vrot.slane %v2664_v14, 2 }
 0x2f6   :  { %v2672_v36 = vrot.slane %v2671_v25, 2 }
 0x2f7   :  { %v2666_v50 = vadd.f32 %v2665_v49, %v2664_v14  ;;  %v2595_v14 = vunpack.c.0.s8 %v2594_v37 }
 0x2f8   :  { %v2673_v52 = vadd.f32 %v2672_v36, %v2671_v25 }
 0x2f9   :  { %v2667_v6 = vrot.slane %v2666_v50, 1 }
 0x2fa   :  { %v2674_v53 = vrot.slane %v2673_v52, 1 }
 0x2fb   :  { %v4444_v18 = vadd.f32 %v2667_v6, %v2666_v50 }
 0x2fc   :  { %v4446_v54 = vadd.f32 %v2674_v53, %v2673_v52 }
 0x2fe   :  { %v2694_v58 = vcombine.low %v4444_v18, %v4446_v54  ;;  %v2755_v18 = vld [vmem:[%s4595_s5 + $0x108] sm:$0xff] }
 0x315   :  { %v2450_v63 = vpop.f32.mrb[12].mxu1 }
 0x316   :  { %v3382_v61 = vadd.f32 %v2450_v63, %v4291_v46  ;;  %v2452_v62 = vpop.f32.mrb[13].mxu1 }
 0x317   :  { %v3383_v1 = vadd.f32 %v2452_v62, %v4293_v28  ;;  %v2454_v39 = vpop.f32.mrb[14].mxu1 }
 0x318   :  { %v2521_v2 = vadd.f32 %v3382_v61, %v2510_v17  ;;  %v3384_v9 = vadd.f32 %v2454_v39, %v4295_v48  ;;  %v2456_v3 = vpop.f32.mrb[15].mxu1 }
 0x319   :  { %v2522_v11 = vadd.f32 %v3383_v1, %v2514_v10  ;;  %v3385_v51 = vadd.f32 %v2456_v3, %v4297_v8 }
 0x31a   :  { %v2525_v29 = vadd.f32 %v3384_v9, %v2510_v17  ;;  %v2541_v41 = vmax.f32 %v2521_v2, 0.0 }
 0x31b   :  { %v2526_v47 = vadd.f32 %v3385_v51, %v2514_v10  ;;  %v2542_v16 = vmax.f32 %v2522_v11, 0.0 }
 0x31c   :  { %v2545_v15 = vmax.f32 %v2525_v29, 0.0 }
 0x31d   :  { %v2546_v38 = vmax.f32 %v2526_v47, 0.0  ;;  %v2460_v4 = vpop.f32.mrb[16].mxu1 }
 0x31e   :  { %v2573_v20 = vadd.f32 %v2545_v15, %v2541_v41  ;;  %v3386_v46 = vadd.f32 %v2460_v4, %v4299_v56  ;;  %v2462_v5 = vpop.f32.mrb[17].mxu1 }
 0x31f   :  { %v2580_v28 = vadd.f32 %v2546_v38, %v2542_v16  ;;  %v3387_v0 = vadd.f32 %v2462_v5, %v4301_v57  ;;  %v2464_v21 = vpop.f32.mrb[18].mxu1 }
 0x320   :  { %v2574_v48 = vrot.slane %v2573_v20, 4  ;;  %v2529_v23 = vadd.f32 %v3386_v46, %v2510_v17  ;;  %v3388_v7 = vadd.f32 %v2464_v21, %v4303_v19  ;;  %v2466_v8 = vpop.f32.mrb[19].mxu1 }
 0x321   :  { %v2581_v31 = vrot.slane %v2580_v28, 4  ;;  %v2530_v34 = vadd.f32 %v3387_v0, %v2514_v10  ;;  %v3389_v42 = vadd.f32 %v2466_v8, %v4305_v13  ;;  %v2766_v0 = vld [vmem:[%s4595_s5 + $0x160] sm:$0xff] }
 0x322   :  { %v2575_v35 = vadd.f32 %v2574_v48, %v2573_v20  ;;  %v2549_v22 = vmax.f32 %v2529_v23, 0.0  ;;  %v2533_v12 = vadd.f32 %v3388_v7, %v2510_v17 }
 0x323   :  { %v2582_v56 = vadd.f32 %v2581_v31, %v2580_v28  ;;  %v2550_v30 = vmax.f32 %v2530_v34, 0.0  ;;  %v2534_v45 = vadd.f32 %v3389_v42, %v2514_v10 }
 0x324   :  { %v2576_v24 = vrot.slane %v2575_v35, 2  ;;  %v2553_v57 = vmax.f32 %v2533_v12, 0.0  ;;  %v2640_v50 = vrot.slane %v2549_v22, 2  ;;  %v3882_v12 = vmov 1983009808  }
 0x325   :  { %v2583_v25 = vrot.slane %v2582_v56, 2  ;;  %v2554_v49 = vmax.f32 %v2534_v45, 0.0  ;;  %v2470_v36 = vpop.f32.mrb[28].mxu1  ;;  %v2643_v13 = vrot.slane %v2550_v30, 2 }
 0x326   :  { %v2577_v19 = vadd.f32 %v2576_v24, %v2575_v35  ;;  %v2641_v52 = vrot.slane %v2553_v57, 2  ;;  %v2495_v6 = vadd.f32 %v2470_v36, %v4319_v40  ;;  %v2472_v53 = vpop.f32.mrb[29].mxu1  ;;  %v2598_v40 = vsub.s32 %v2595_v14, %v4076_v32  ;;  %v2754_v14 = vld [vmem:[%s4595_s5 + $0x100] sm:$0xff] }
 0x327   :  { %v2584_v59 = vadd.f32 %v2583_v25, %v2582_v56  ;;  %v2644_v60 = vrot.slane %v2554_v49, 2  ;;  %v2496_v63 = vadd.f32 %v2472_v53, %v4321_v55  ;;  %v2474_v61 = vpop.f32.mrb[30].mxu1  ;;  %v2796_v56 = vunpack.c.l.s4 %v3882_v12  ;;  %v2772_v25 = vld [vmem:[%s4595_s5 + $0x190] sm:$0xff]  ;;  %v2773_v49 = vld [vmem:[%s4595_s5 + $0x198] sm:$0xff] }
 0x328   :  { %v2578_v62 = vrot.slane %v2577_v19, 1  ;;  %v2642_v1 = vsel %vm2633_vm0, %v2640_v50, %v2641_v52  ;;  %v2537_v39 = vadd.f32 %v2510_v17, %v2495_v6  ;;  %v2475_v2 = vpop.f32.mrb[31].mxu1  ;;  %v2599_v17 = vrot.slane %v2591_v44, %v2598_v40  ;;  %v2757_v6 = vld [vmem:[%s4595_s5 + $0x118] sm:$0xff]  ;;  %v2758_v61 = vld [vmem:[%s4595_s5 + $0x120] sm:$0xff] }
 0x329   :  { %v2585_v9 = vrot.slane %v2584_v59, 1  ;;  %v2645_v3 = vsel %vm2633_vm0, %v2643_v13, %v2644_v60  ;;  %v2538_v11 = vadd.f32 %v2514_v10, %v2496_v63  ;;  %v2702_v27 = vrot.slane %v2694_v58, %v2598_v40  ;;  %v2775_v13 = vld [vmem:[%s4595_s5 + $0x1a8] sm:$0xff] }
 0x32a   :  { %v2579_v51 = vadd.f32 %v2578_v62, %v2577_v19  ;;  %v2557_v29 = vmax.f32 %v2537_v39, 0.0  ;;  %v2797_v45 = vunpack.c.0.s8 %v2796_v56  ;;  %v3344_v36 = vpack.c.bf16 %v2755_v18, %v2754_v14  ;;  %v2759_v62 = vld [vmem:[%s4595_s5 + $0x128] sm:$0xff]  ;;  %v2777_v39 = vld [vmem:[%s4595_s5 + $0x1b8] sm:$0xff] }
 0x32b   :  { %v2586_v47 = vadd.f32 %v2585_v9, %v2584_v59  ;;  %v2558_v41 = vmax.f32 %v2538_v11, 0.0  ;;  %v3346_v50 = vpack.c.bf16 %v2773_v49, %v2772_v25  ;;  %v2774_v59 = vld [vmem:[%s4595_s5 + $0x1a0] sm:$0xff]  ;;  %v3352_v2 = vpack.c.bf16 %v2759_v62, %v2758_v61  ;;  %v2761_v11 = vld [vmem:[%s4595_s5 + $0x138] sm:$0xff] }
 0x32c   :  { %v2650_v15 = vrot.slane %v2557_v29, 2  ;;  %v2800_v24 = vsub.s32 %v2797_v45, %v4076_v32  ;;  %v3350_v63 = vpack.c.bf16 %v2775_v13, %v2774_v59  ;;  %v2779_v29 = vld [vmem:[%s4595_s5 + $0x1c8] sm:$0xff] }
 0x32d   :  { %v2592_v16 = vcombine.low %v2579_v51, %v2586_v47  ;;  %v2652_v38 = vrot.slane %v2558_v41, 2  ;;  %v2778_v51 = vld [vmem:[%s4595_s5 + $0x1c0] sm:$0xff] }
 0x32e   :  { %v2651_v55 = vsel %vm2633_vm0, %v2641_v52, %v2650_v15  ;;  %v2756_v52 = vld [vmem:[%s4595_s5 + $0x110] sm:$0xff]  ;;  %v3358_v47 = vpack.c.bf16 %v2779_v29, %v2778_v51  ;;  %v2762_v41 = vld [vmem:[%s4595_s5 + $0x140] sm:$0xff]  ;;  %v2763_v15 = vld [vmem:[%s4595_s5 + $0x148] sm:$0xff] }
 0x32f   :  { %v2606_v4 = vrot.slane %v2592_v16, %v2598_v40  ;;  %v2676_v20 = vadd.f32 %v2651_v55, %v2642_v1  ;;  %v2653_v46 = vsel %vm2633_vm0, %v2644_v60, %v2652_v38  ;;  %v3348_v60 = vpack.c.bf16 %v2757_v6, %v2756_v52  ;;  %v2776_v1 = vld [vmem:[%s4595_s5 + $0x1b0] sm:$0xff]  ;;  %v2781_v38 = vld [vmem:[%s4595_s5 + $0x1d8] sm:$0xff] }
 0x330   :  { %v2683_v10 = vadd.f32 %v2653_v46, %v2645_v3  ;;  %v3354_v9 = vpack.c.bf16 %v2777_v39, %v2776_v1  ;;  %v2760_v3 = vld [vmem:[%s4595_s5 + $0x130] sm:$0xff]  ;;  %v3360_v55 = vpack.c.bf16 %v2763_v15, %v2762_v41  ;;  %v2782_v46 = vld [vmem:[%s4595_s5 + $0x1e0] sm:$0xff] }
 0x331   :  { %v2607_v5 = vcombine.low %v2599_v17, %v2606_v4  ;;  %v2677_v28 = vrot.slane %v2676_v20, 4  ;;  %v2780_v16 = vld [vmem:[%s4595_s5 + $0x1d0] sm:$0xff] }
 0x332   :  { %v2684_v21 = vrot.slane %v2683_v10, 4  ;;  %v3362_v17 = vpack.c.bf16 %v2781_v38, %v2780_v16  ;;  %v2764_v4 = vld [vmem:[%s4595_s5 + $0x150] sm:$0xff] }
 0x333   :  { %v2614_v48 = vrot.slane %v2607_v5, %v2598_v40  ;;  %v2678_v23 = vadd.f32 %v2677_v28, %v2676_v20  ;;  %v2765_v20 = vld [vmem:[%s4595_s5 + $0x158] sm:$0xff] }
 0x334   :  { %v2685_v7 = vadd.f32 %v2684_v21, %v2683_v10  ;;  %v2783_v10 = vld [vmem:[%s4595_s5 + $0x1e8] sm:$0xff]  ;;  %v3364_v5 = vpack.c.bf16 %v2765_v20, %v2764_v4 }
 0x335   :  { %2620 = vst.msk [vmem:[#allocation4] ss:$2 sm:$0xf] %vm4473_vm2, %v2614_v48  ;;  %v2679_v26 = vrot.slane %v2678_v23, 2  ;;  %v3366_v28 = vpack.c.bf16 %v2783_v10, %v2782_v46  ;;  %v2767_v21 = vld [vmem:[%s4595_s5 + $0x168] sm:$0xff]  ;;  %v2784_v48 = vld [vmem:[%s4595_s5 + $0x1f0] sm:$0xff] }
 0x336   :  { %v2686_v43 = vrot.slane %v2685_v7, 2 }
 0x337   :  { %v2680_v44 = vadd.f32 %v2679_v26, %v2678_v23  ;;  %v2785_v23 = vld [vmem:[%s4595_s5 + $0x1f8] sm:$0xff] }
 0x338   :  { %v2687_v8 = vadd.f32 %v2686_v43, %v2685_v7  ;;  %v3368_v7 = vpack.c.bf16 %v2767_v21, %v2766_v0  ;;  %v3370_v26 = vpack.c.bf16 %v2785_v23, %v2784_v48  ;;  %v2768_v43 = vld [vmem:[%s4595_s5 + $0x170] sm:$0xff] }
 0x339   :  { %v2681_v33 = vrot.slane %v2680_v44, 1 }
 0x33a   :  { %v2688_v37 = vrot.slane %v2687_v8, 1 }
 0x33b   :  { %v2682_v31 = vadd.f32 %v2681_v33, %v2680_v44  ;;  %v2769_v44 = vld [vmem:[%s4595_s5 + $0x178] sm:$0xff]  ;;  %s3846_s5 = scalar_lea.vmem %s2963_s9, 32 }
 0x33c   :  { %v2689_v34 = vadd.f32 %v2688_v37, %v2687_v8  ;;  %v3372_v8 = vpack.c.bf16 %v2769_v44, %v2768_v43  ;;  %p3847_p2 = scmp.ne.s32.totalorder %s2963_s9, %s3846_s5  ;;  %p3852_p4 = scmp.lt.s32.totalorder %s3846_s5, %s3846_s5 }
 0x33e   :  { %v2695_v42 = vcombine.low %v2682_v31, %v2689_v34  ;;  %v3234_v34 = vld [vmem:[%s4596_s6] ss:$0 sm:$0xff]  ;;  %p3853_p5 = por %p3852_p4, %p3851_p3 }
 0x340   :  { %v2709_v35 = vrot.slane %v2695_v42, %v2598_v40  ;;  %p3854_p6 = pnand %p3853_p5, %p3847_p2 }
 0x342   :  { %v2710_v22 = vcombine.low %v2702_v27, %v2709_v35 }
 0x344   :  { %v2717_v30 = vrot.slane %v2710_v22, %v2598_v40  ;;  %v3356_v40 = vpack.c.bf16 %v2761_v11, %v2760_v3 }
 0x346   :  { %2720 = vst.msk [vmem:[#allocation4 + $0x1] ss:$2 sm:$0xf] %vm4473_vm2, %v2717_v30 }
 0x34d   :  { %v2721_v57 = vld [vmem:[#allocation4] sm:$0xff] }
 0x34e   :  { %v2801_v54 = vrot.slane %v2721_v57, %v2800_v24  ;;  %v2794_v58 = vcombine.high %v2721_v57, %v2721_v57 }
 0x350   :  { %v2809_v32 = vcombine.high %v2801_v54, %v2801_v54  ;;  %v2808_v19 = vrot.slane %v2794_v58, %v2800_v24 }
 0x352   :  { %2879 = vmatprep.mubr.f32.mxu0 %v2809_v32  ;;  %v2810_v53 = vcombine.high %v2808_v19, %v2808_v19 }
 0x353   :  { %2880 = vmatmul.mubr.f32.vlgmr.msra.gmra.mrb[44].mxu0 %v2801_v54 }
 0x354   :  { %3345 = vmatpush3.bf16.msra.mxu0 %v3344_v36  ;;  %2949 = vmatprep.mubr.f32.mxu0 %v2810_v53 }
 0x355   :  { %3347 = vmatprep.subr.bf16.mxu0 %v3346_v50 }
 0x358   :  { %3349 = vmatpush3.bf16.msra.mxu0 %v3348_v60 }
 0x359   :  { %3351 = vmatprep.subr.bf16.mxu0 %v3350_v63 }
 0x35c   :  { %3353 = vmatpush3.bf16.msra.mxu0 %v3352_v2 }
 0x35d   :  { %3355 = vmatprep.subr.bf16.mxu0 %v3354_v9 }
 0x360   :  { %3357 = vmatpush3.bf16.msra.mxu0 %v3356_v40 }
 0x361   :  { %3359 = vmatprep.subr.bf16.mxu0 %v3358_v47 }
 0x364   :  { %3361 = vmatpush3.bf16.msra.mxu0 %v3360_v55 }
 0x365   :  { %3363 = vmatprep.subr.bf16.mxu0 %v3362_v17 }
 0x368   :  { %3365 = vmatpush3.bf16.msra.mxu0 %v3364_v5 }
 0x369   :  { %3367 = vmatprep.subr.bf16.mxu0 %v3366_v28 }
 0x36c   :  { %3369 = vmatpush3.bf16.msra.mxu0 %v3368_v7 }
 0x36d   :  { %3371 = vmatprep.subr.bf16.mxu0 %v3370_v26 }
 0x370   :  { %3373 = vmatpush3.bf16.msra.mxu0 %v3372_v8 }
 0x373   :  { %2950 = vmatmul.mubr.f32.vlgmr.msra.gmra.mrb[46].mxu0 %v2808_v19 }
 0x426   :  { %v3272_v33 = vpop.f32.mrb[44].mxu0 }
 0x427   :  { %v3273_v37 = vpop.f32.mrb[45].mxu0 }
 0x428   :  { %v3274_v31 = vadd.f32 %v3273_v37, %v3272_v33 }
 0x42a   :  { %v2882_v35 = vadd.f32 %v3274_v31, %v3234_v34 }
 0x446   :  { %v3307_v42 = vpop.f32.mrb[46].mxu0 }
 0x447   :  { %v3308_v27 = vpop.f32.mrb[47].mxu0 }
 0x448   :  { %v3309_v22 = vadd.f32 %v3308_v27, %v3307_v42 }
 0x44a   :  { %v2952_v12 = vadd.f32 %v3309_v22, %v2882_v35 }
 0x44c   :  { %2955 = vst [vmem:[#allocation10] sm:$0x3] %v2952_v12 }
 0x44d   :  { %3857 = shalt.err (!%p3854_p6)
}
 0x44e   :  { %s3858_s6 = scalar_lea.hbm %s4597_s7, 32 }
 0x44f   :  { %p3859_p7 = scmp.ne.s32.totalorder %s4597_s7, %s3858_s6  ;;  %p3862_p8 = scmp.lt.u32.totalorder %s3858_s6, %s4597_s7 }
 0x451   :  { %p3864_p9 = pnand %p3862_p8, %p3859_p7 }
 0x453   :  { %3867 = shalt.err (!%p3864_p9)
}
 0x454   :  { %2965 = dma.vmem_to_hbm [thread:$0]  %s2963_s9, 32, %s4597_s7, [#allocation7]  }
 0x455   :  { %3872 = dma.done.wait [#allocation7], 32  }
 0x456   :  { %3873 = vsyncadd [#allocation7], 4294967264 }
 0x457   :  { %2969 = vsyncpa [#allocation6], 1 }
 0x458   :  { %2970 = vsyncpa [#allocation9], 1 }
 0x459   :  { %2971 = vsyncpa [#allocation7], 1 }

</bundles_post_ra>
